<compile_context>
chip_gen: v5e
topology: v5e:2x2
jax: 0.10.0
libtpu: 0.0.40
codegen_flags: <defaults>
</compile_context>

<pallas_src>
import jax
import jax.numpy as jnp
from jax.experimental import pallas as pl
from jax.experimental.pallas import tpu as pltpu

# ---- small synthetic OPT config (shapes consistent with an OPT decoder) ----
VOCAB = 128
HIDDEN = 32
NUM_HEADS = 4
HEAD_DIM = HIDDEN // NUM_HEADS
FFN = 64
N_LAYERS = 2
MAX_POS = 64          # learned positional embedding table (with OPT offset of 2)
BATCH = 2
SEQ = 8

_NEG_INF = -1e30


def _layer_norm(x, g, b, eps=1e-5):
    mu = jnp.mean(x, axis=-1, keepdims=True)
    var = jnp.mean(jnp.square(x - mu), axis=-1, keepdims=True)
    return (x - mu) * jax.lax.rsqrt(var + eps) * g + b


def _dot_bf16(a, b):
    # MXU dot with bf16 operands, f32 accumulation.
    return jnp.dot(a.astype(jnp.bfloat16), b.astype(jnp.bfloat16),
                   preferred_element_type=jnp.float32)


# -------------------- fused Pallas kernel: one sequence per grid step --------------------
def galactica_fwd_kernel(len_ref,                     # SMEM (B,) int32  (scalar prefetch)
                         x_ref,                       # (1, S, H) f32 embeddings for this sequence
                         wattn_ref,                   # (L, 3, H, H) bf16  Wq (pre-scaled) / Wk / Wv
                         wo_ref, w1_ref, w2_ref,      # stacked bf16 weights (resident)
                         vec_ref,                     # (L, 10, FFN) f32 biases + LN params
                         amask_ref,                   # (S, NH*S) f32 additive causal mask
                         hvm_ref,                     # (NH*S, H) f32 0/1 head-block-diag mask
                         fln_ref,                     # (2, H) f32 final LN gain/bias
                         lmh_ref,                     # (H, V) bf16 tied LM head
                         out_ref,                     # (1, 1, V) f32
                         xs_ref):                     # VMEM scratch (S, H) f32
    x = x_ref[0]                                      # (S, H) f32
    amask = amask_ref[...]                            # (S, NH*S)
    hvm = hvm_ref[...]                                # (NH*S, H)

    for l in range(N_LAYERS):                         # static unroll over layers
        vec = vec_ref[l]                              # (10, FFN) packed per-layer vectors
        b_q = vec[0:1, :HIDDEN]                       # (scale already folded in at init)
        b_k = vec[1:2, :HIDDEN]
        b_v = vec[2:3, :HIDDEN]
        b_o = vec[3:4, :HIDDEN]
        b_1 = vec[4:5, :FFN]
        b_2 = vec[5:6, :HIDDEN]
        ln1g, ln1b = vec[6:7, :HIDDEN], vec[7:8, :HIDDEN]
        ln2g, ln2b = vec[8:9, :HIDDEN], vec[9:10, :HIDDEN]

        # ---- self-attention block (pre-LayerNorm, causal) ----
        hn = _layer_norm(x, ln1g, ln1b)
        hn_b = hn.astype(jnp.bfloat16)
        q = jnp.dot(hn_b, wattn_ref[l, 0], preferred_element_type=jnp.float32) + b_q
        k = jnp.dot(hn_b, wattn_ref[l, 1], preferred_element_type=jnp.float32) + b_k
        v = jnp.dot(hn_b, wattn_ref[l, 2], preferred_element_type=jnp.float32) + b_v

        # head-block-diagonal K and V, BOTH in (NH*S, H) layout (no transpose), masked in f32
        kbd = (jnp.tile(k, (NUM_HEADS, 1)) * hvm).astype(jnp.bfloat16)
        vbd = (jnp.tile(v, (NUM_HEADS, 1)) * hvm).astype(jnp.bfloat16)

        # scores = q @ K^T for all heads as one MXU dot, contracting dim 1 with dim 1
        scores = jax.lax.dot_general(q.astype(jnp.bfloat16), kbd,
                                     (((1,), (1,)), ((), ())),
                                     preferred_element_type=jnp.float32)   # (S, NH*S)
        scores = scores + amask                                            # additive causal mask

        s3 = scores.reshape(SEQ, NUM_HEADS, SEQ)                           # per-head softmax (f32)
        s3 = s3 - jnp.max(s3, axis=-1, keepdims=True)
        p3 = jnp.exp(s3)
        # approx reciprocal (~1e-3 rel err) routed to the EUP; deliberate deviation from exact div.
        p3 = p3 * pl.reciprocal(jnp.sum(p3, axis=-1, keepdims=True), approx=True)
        p = p3.reshape(SEQ, NUM_HEADS * SEQ)

        attn = _dot_bf16(p, vbd)                                           # (S, H)
        x = x + _dot_bf16(attn, wo_ref[l]) + b_o

        # ---- feed-forward block (pre-LayerNorm, tanh-GELU -> EUP slot) ----
        hn = _layer_norm(x, ln2g, ln2b)
        h1 = jax.nn.gelu(_dot_bf16(hn, w1_ref[l]) + b_1, approximate=True)
        x = x + _dot_bf16(h1, w2_ref[l]) + b_2

    # ---- final LN + tied LM head, only at the selected position ----
    # quirk: logits[:, lengths, :][:, 0, :] -> every batch row uses position lengths[0]
    xs_ref[...] = x
    pos = len_ref[0]
    x_last = xs_ref[pl.ds(pos, 1), :]                                      # (1, H) dynamic row gather

    fln = fln_ref[...]
    xn = _layer_norm(x_last, fln[0:1], fln[1:2])
    out_ref[0] = _dot_bf16(xn, lmh_ref[...])                               # (1, V), lane-dense


# -------------------- wrapper --------------------
def galactica_encoder_forward(token_ids, lengths, params):
    """Equivalent of GalacticaEncoder.forward / encode_txt on pre-tokenized ids."""
    b, s = token_ids.shape
    # embedding lookups are glue (gather), done in plain JAX
    tok = jnp.take(params['embed_tokens'], token_ids, axis=0)              # (B, S, H)
    pos = params['embed_positions'][2:2 + s]                               # OPT offset = 2
    x = (tok + pos[None, :, :]).astype(jnp.float32)                        # (B, S, H)

    # guard: PyTorch indexing would raise on OOB; clamp instead of silently zeroing
    lengths = jnp.clip(lengths.astype(jnp.int32), 0, s - 1)

    full = lambda a, im: pl.BlockSpec(a.shape, im)                         # resident operand (block 0)

    grid_spec = pltpu.PrefetchScalarGridSpec(
        num_scalar_prefetch=1,                                             # lengths -> SMEM
        grid=(b,),
        in_specs=[
            pl.BlockSpec((1, s, HIDDEN), lambda i, ln: (i, 0, 0)),         # activations stream
            full(params['w_attn'],   lambda i, ln: (0, 0, 0, 0)),          # weights stay resident
            full(params['wo'],       lambda i, ln: (0, 0, 0)),
            full(params['w1'],       lambda i, ln: (0, 0, 0)),
            full(params['w2'],       lambda i, ln: (0, 0, 0)),
            full(params['vecs'],     lambda i, ln: (0, 0, 0)),
            full(params['attn_bias'], lambda i, ln: (0, 0)),
            full(params['hv_mask'],  lambda i, ln: (0, 0)),
            full(params['final_ln'], lambda i, ln: (0, 0)),
            full(params['lm_head'],  lambda i, ln: (0, 0)),
        ],
        out_specs=pl.BlockSpec((1, 1, VOCAB), lambda i, ln: (i, 0, 0)),
        scratch_shapes=[pltpu.VMEM((s, HIDDEN), jnp.float32)],
    )

    out = pl.pallas_call(
        galactica_fwd_kernel,
        out_shape=jax.ShapeDtypeStruct((b, 1, VOCAB), jnp.float32),
        grid_spec=grid_spec,
        compiler_params=pltpu.CompilerParams(dimension_semantics=("parallel",)),
    )(lengths, x,
      params['w_attn'], params['wo'], params['w1'], params['w2'],
      params['vecs'], params['attn_bias'], params['hv_mask'],
      params['final_ln'], params['lm_head'])
    return out.reshape(b, VOCAB)


# -------------------- deterministic synthetic parameters --------------------
def init_params(key):
    keys = iter(jax.random.split(key, 64))

    def nrm(shape, scale=0.02):
        return jax.random.normal(next(keys), shape, jnp.float32) * scale

    embed_tokens = nrm((VOCAB, HIDDEN))
    embed_positions = nrm((MAX_POS + 2, HIDDEN))

    attn_scale = HEAD_DIM ** -0.5
    w_attn, wo, w1, w2, vecs = [], [], [], [], []
    for _ in range(N_LAYERS):
        wq = nrm((HIDDEN, HIDDEN)) * attn_scale        # attention scale folded into Wq
        wk = nrm((HIDDEN, HIDDEN))
        wv = nrm((HIDDEN, HIDDEN))
        w_attn.append(jnp.stack([wq, wk, wv]))         # (3, H, H)
        wo.append(nrm((HIDDEN, HIDDEN)))
        w1.append(nrm((HIDDEN, FFN)))
        w2.append(nrm((FFN, HIDDEN)))
        # packed vector slab rows:
        # 0 b_q (scale-folded) | 1 b_k | 2 b_v | 3 b_o | 4 b_1 | 5 b_2 | 6 ln1g | 7 ln1b | 8 ln2g | 9 ln2b
        vec = jnp.zeros((10, FFN), jnp.float32)        # biases are zero; b_q would also get *attn_scale
        vec = vec.at[6, :HIDDEN].set(1.0)              # ln1 gain
        vec = vec.at[8, :HIDDEN].set(1.0)              # ln2 gain
        vecs.append(vec)

    # ---- host-precomputed static masks (passed as tiny VMEM operands) ----
    t = jnp.arange(SEQ)
    causal = t[None, :] <= t[:, None]                                         # (S, S)
    attn_bias = jnp.tile(jnp.where(causal, 0.0, _NEG_INF).astype(jnp.float32),
                         (1, NUM_HEADS))                                      # (S, NH*S) additive
    r = jnp.arange(NUM_HEADS * SEQ)
    c = jnp.arange(HIDDEN)
    hv_mask = ((r[:, None] // SEQ) == (c[None, :] // HEAD_DIM)
               ).astype(jnp.float32)                                          # (NH*S, H) 0/1

    return {
        'embed_tokens': embed_tokens,                                         # (V, H) f32 for lookup
        'embed_positions': embed_positions,
        'w_attn': jnp.stack(w_attn).astype(jnp.bfloat16),                     # (L, 3, H, H)
        'wo': jnp.stack(wo).astype(jnp.bfloat16),                             # (L, H, H)
        'w1': jnp.stack(w1).astype(jnp.bfloat16),                             # (L, H, FFN)
        'w2': jnp.stack(w2).astype(jnp.bfloat16),                             # (L, FFN, H)
        'vecs': jnp.stack(vecs),                                              # (L, 10, FFN) f32
        'attn_bias': attn_bias,                                               # (S, NH*S) f32
        'hv_mask': hv_mask,                                                   # (NH*S, H) f32
        'final_ln': jnp.stack([jnp.ones((HIDDEN,), jnp.float32),
                               jnp.zeros((HIDDEN,), jnp.float32)]),           # (2, H)
        'lm_head': embed_tokens.T.astype(jnp.bfloat16),                       # tied, pre-transposed (H, V)
        # TODO(synk): at real galactica-125m dims (H=768, V~50k) the LM head must be vocab-tiled
        # (bf16 tied head alone is ~77 MiB > v7x's 64 MiB VMEM); resident-whole only at toy size.
    }


if __name__ == "__main__":
    key = jax.random.PRNGKey(0)
    k_par, k_ids = jax.random.split(key)

    params = init_params(k_par)

    # TODO(synk): the HuggingFace tokenizer / pretrained galactica-125m checkpoint have no
    # Pallas/JAX equivalent — synthetic token ids, lengths and weights stand in for them.
    token_ids = jax.random.randint(k_ids, (BATCH, SEQ), 1, VOCAB, dtype=jnp.int32)
    lengths = jnp.array([SEQ - 1, SEQ - 3], dtype=jnp.int32)   # "length - 1" as in tokenize_txt

    out = galactica_encoder_forward(token_ids, lengths, params)
    out = jax.block_until_ready(out)

    assert out.shape == (BATCH, VOCAB), out.shape
    assert bool(jnp.all(jnp.isfinite(out)))
    print("KERNEL_OK")
</pallas_src>

<mosaic_0001>
module attributes {stable_mosaic.version = 11 : i64} {
  func.func @galactica_fwd_kernel(%arg0: i32, %arg1: memref<2xi32, #tpu.memory_space<smem>>, %arg2: memref<1x8x32xf32, #tpu.memory_space<vmem>>, %arg3: memref<2x3x32x32xbf16, #tpu.memory_space<vmem>>, %arg4: memref<2x32x32xbf16, #tpu.memory_space<vmem>>, %arg5: memref<2x32x64xbf16, #tpu.memory_space<vmem>>, %arg6: memref<2x64x32xbf16, #tpu.memory_space<vmem>>, %arg7: memref<2x10x64xf32, #tpu.memory_space<vmem>>, %arg8: memref<8x32xf32, #tpu.memory_space<vmem>>, %arg9: memref<32x32xf32, #tpu.memory_space<vmem>>, %arg10: memref<2x32xf32, #tpu.memory_space<vmem>>, %arg11: memref<32x128xbf16, #tpu.memory_space<vmem>>, %arg12: memref<1x1x128xf32, #tpu.memory_space<vmem>>, %arg13: memref<8x32xf32, #tpu.memory_space<vmem>>) attributes {dimension_semantics = [#tpu.dimension_semantics<parallel>], iteration_bounds = array<i64: 2>, scalar_prefetch = 1 : i64, scratch_operands = 1 : i64, tpu.core_type = #tpu.core_type<tc>, window_params = [{transform_indices = @transform_0, window_bounds = array<i64: 1, 8, 32>}, {pipeline_mode = #tpu.pipeline_mode<synchronous>, transform_indices = @transform_1, window_bounds = array<i64: 2, 3, 32, 32>}, {pipeline_mode = #tpu.pipeline_mode<synchronous>, transform_indices = @transform_2, window_bounds = array<i64: 2, 32, 32>}, {pipeline_mode = #tpu.pipeline_mode<synchronous>, transform_indices = @transform_3, window_bounds = array<i64: 2, 32, 64>}, {pipeline_mode = #tpu.pipeline_mode<synchronous>, transform_indices = @transform_4, window_bounds = array<i64: 2, 64, 32>}, {pipeline_mode = #tpu.pipeline_mode<synchronous>, transform_indices = @transform_5, window_bounds = array<i64: 2, 10, 64>}, {pipeline_mode = #tpu.pipeline_mode<synchronous>, transform_indices = @transform_6, window_bounds = array<i64: 8, 32>}, {pipeline_mode = #tpu.pipeline_mode<synchronous>, transform_indices = @transform_7, window_bounds = array<i64: 32, 32>}, {pipeline_mode = #tpu.pipeline_mode<synchronous>, transform_indices = @transform_8, window_bounds = array<i64: 2, 32>}, {pipeline_mode = #tpu.pipeline_mode<synchronous>, transform_indices = @transform_9, window_bounds = array<i64: 32, 128>}, {transform_indices = @transform_10, window_bounds = array<i64: 1, 1, 128>}]} {
    %c0 = arith.constant 0 : index
    %c0_0 = arith.constant 0 : index
    %c0_1 = arith.constant 0 : index
    %0 = vector.load %arg2[%c0, %c0_0, %c0_1] : memref<1x8x32xf32, #tpu.memory_space<vmem>>, vector<1x8x32xf32>
    %1 = vector.shape_cast %0 : vector<1x8x32xf32> to vector<8x32xf32>
    %c0_2 = arith.constant 0 : index
    %c0_3 = arith.constant 0 : index
    %2 = vector.load %arg8[%c0_2, %c0_3] : memref<8x32xf32, #tpu.memory_space<vmem>>, vector<8x32xf32>
    %c0_4 = arith.constant 0 : index
    %c0_5 = arith.constant 0 : index
    %3 = vector.load %arg9[%c0_4, %c0_5] : memref<32x32xf32, #tpu.memory_space<vmem>>, vector<32x32xf32>
    %c0_6 = arith.constant 0 : index
    %c0_7 = arith.constant 0 : index
    %c0_8 = arith.constant 0 : index
    %4 = vector.load %arg7[%c0_6, %c0_7, %c0_8] : memref<2x10x64xf32, #tpu.memory_space<vmem>>, vector<1x10x64xf32>
    %5 = vector.shape_cast %4 : vector<1x10x64xf32> to vector<10x64xf32>
    %6 = vector.extract_strided_slice %5 {offsets = [0, 0], sizes = [1, 32], strides = [1, 1]} : vector<10x64xf32> to vector<1x32xf32>
    %7 = vector.extract_strided_slice %5 {offsets = [1, 0], sizes = [1, 32], strides = [1, 1]} : vector<10x64xf32> to vector<1x32xf32>
    %8 = vector.extract_strided_slice %5 {offsets = [2, 0], sizes = [1, 32], strides = [1, 1]} : vector<10x64xf32> to vector<1x32xf32>
    %9 = vector.extract_strided_slice %5 {offsets = [3, 0], sizes = [1, 32], strides = [1, 1]} : vector<10x64xf32> to vector<1x32xf32>
    %10 = vector.extract_strided_slice %5 {offsets = [4, 0], sizes = [1, 64], strides = [1, 1]} : vector<10x64xf32> to vector<1x64xf32>
    %11 = vector.extract_strided_slice %5 {offsets = [5, 0], sizes = [1, 32], strides = [1, 1]} : vector<10x64xf32> to vector<1x32xf32>
    %12 = vector.extract_strided_slice %5 {offsets = [6, 0], sizes = [1, 32], strides = [1, 1]} : vector<10x64xf32> to vector<1x32xf32>
    %13 = vector.extract_strided_slice %5 {offsets = [7, 0], sizes = [1, 32], strides = [1, 1]} : vector<10x64xf32> to vector<1x32xf32>
    %14 = vector.extract_strided_slice %5 {offsets = [8, 0], sizes = [1, 32], strides = [1, 1]} : vector<10x64xf32> to vector<1x32xf32>
    %15 = vector.extract_strided_slice %5 {offsets = [9, 0], sizes = [1, 32], strides = [1, 1]} : vector<10x64xf32> to vector<1x32xf32>
    %cst = arith.constant dense<0.000000e+00> : vector<8xf32>
    %16 = vector.multi_reduction <add>, %1, %cst [1] : vector<8x32xf32> to vector<8xf32>
    %17 = vector.shape_cast %16 : vector<8xf32> to vector<8x1xf32>
    %cst_9 = arith.constant 3.200000e+01 : f32
    %18 = vector.broadcast %cst_9 : f32 to vector<8x1xf32>
    %19 = arith.divf %17, %18 : vector<8x1xf32>
    %20 = vector.broadcast %19 : vector<8x1xf32> to vector<8x32xf32>
    %21 = arith.subf %1, %20 : vector<8x32xf32>
    %22 = arith.mulf %21, %21 : vector<8x32xf32>
    %cst_10 = arith.constant dense<0.000000e+00> : vector<8xf32>
    %23 = vector.multi_reduction <add>, %22, %cst_10 [1] : vector<8x32xf32> to vector<8xf32>
    %24 = vector.shape_cast %23 : vector<8xf32> to vector<8x1xf32>
    %cst_11 = arith.constant 3.200000e+01 : f32
    %25 = vector.broadcast %cst_11 : f32 to vector<8x1xf32>
    %26 = arith.divf %24, %25 : vector<8x1xf32>
    %27 = vector.broadcast %19 : vector<8x1xf32> to vector<8x32xf32>
    %28 = arith.subf %1, %27 : vector<8x32xf32>
    %cst_12 = arith.constant 9.99999974E-6 : f32
    %29 = vector.broadcast %cst_12 : f32 to vector<8x1xf32>
    %30 = arith.addf %26, %29 : vector<8x1xf32>
    %31 = math.rsqrt %30 : vector<8x1xf32>
    %32 = vector.broadcast %31 : vector<8x1xf32> to vector<8x32xf32>
    %33 = arith.mulf %28, %32 : vector<8x32xf32>
    %34 = vector.broadcast %12 : vector<1x32xf32> to vector<8x32xf32>
    %35 = arith.mulf %33, %34 : vector<8x32xf32>
    %36 = vector.broadcast %13 : vector<1x32xf32> to vector<8x32xf32>
    %37 = arith.addf %35, %36 : vector<8x32xf32>
    %38 = arith.truncf %37 : vector<8x32xf32> to vector<8x32xbf16>
    %c0_13 = arith.constant 0 : index
    %c0_14 = arith.constant 0 : index
    %c0_15 = arith.constant 0 : index
    %c0_16 = arith.constant 0 : index
    %39 = vector.load %arg3[%c0_13, %c0_14, %c0_15, %c0_16] : memref<2x3x32x32xbf16, #tpu.memory_space<vmem>>, vector<1x1x32x32xbf16>
    %40 = vector.shape_cast %39 : vector<1x1x32x32xbf16> to vector<32x32xbf16>
    %cst_17 = arith.constant dense<0.000000e+00> : vector<8x32xf32>
    %41 = tpu.matmul %38, %40, %cst_17 {dimension_numbers = #tpu.dot_dimension_numbers<[1], [0], [0], [1], [0, 0, 1, 1], [], []>} : vector<8x32xbf16>, vector<32x32xbf16>, vector<8x32xf32> -> vector<8x32xf32>
    %42 = vector.broadcast %6 : vector<1x32xf32> to vector<8x32xf32>
    %43 = arith.addf %41, %42 : vector<8x32xf32>
    %c0_18 = arith.constant 0 : index
    %c1 = arith.constant 1 : index
    %c0_19 = arith.constant 0 : index
    %c0_20 = arith.constant 0 : index
    %44 = vector.load %arg3[%c0_18, %c1, %c0_19, %c0_20] : memref<2x3x32x32xbf16, #tpu.memory_space<vmem>>, vector<1x1x32x32xbf16>
    %45 = vector.shape_cast %44 : vector<1x1x32x32xbf16> to vector<32x32xbf16>
    %cst_21 = arith.constant dense<0.000000e+00> : vector<8x32xf32>
    %46 = tpu.matmul %38, %45, %cst_21 {dimension_numbers = #tpu.dot_dimension_numbers<[1], [0], [0], [1], [0, 0, 1, 1], [], []>} : vector<8x32xbf16>, vector<32x32xbf16>, vector<8x32xf32> -> vector<8x32xf32>
    %47 = vector.broadcast %7 : vector<1x32xf32> to vector<8x32xf32>
    %48 = arith.addf %46, %47 : vector<8x32xf32>
    %c0_22 = arith.constant 0 : index
    %c2 = arith.constant 2 : index
    %c0_23 = arith.constant 0 : index
    %c0_24 = arith.constant 0 : index
    %49 = vector.load %arg3[%c0_22, %c2, %c0_23, %c0_24] : memref<2x3x32x32xbf16, #tpu.memory_space<vmem>>, vector<1x1x32x32xbf16>
    %50 = vector.shape_cast %49 : vector<1x1x32x32xbf16> to vector<32x32xbf16>
    %cst_25 = arith.constant dense<0.000000e+00> : vector<8x32xf32>
    %51 = tpu.matmul %38, %50, %cst_25 {dimension_numbers = #tpu.dot_dimension_numbers<[1], [0], [0], [1], [0, 0, 1, 1], [], []>} : vector<8x32xbf16>, vector<32x32xbf16>, vector<8x32xf32> -> vector<8x32xf32>
    %52 = vector.broadcast %8 : vector<1x32xf32> to vector<8x32xf32>
    %53 = arith.addf %51, %52 : vector<8x32xf32>
    %54 = tpu.concatenate %48, %48, %48, %48 in 0 : vector<8x32xf32>, vector<8x32xf32>, vector<8x32xf32>, vector<8x32xf32> -> vector<32x32xf32>
    %55 = arith.mulf %54, %3 : vector<32x32xf32>
    %56 = arith.truncf %55 : vector<32x32xf32> to vector<32x32xbf16>
    %57 = tpu.concatenate %53, %53, %53, %53 in 0 : vector<8x32xf32>, vector<8x32xf32>, vector<8x32xf32>, vector<8x32xf32> -> vector<32x32xf32>
    %58 = arith.mulf %57, %3 : vector<32x32xf32>
    %59 = arith.truncf %58 : vector<32x32xf32> to vector<32x32xbf16>
    %60 = arith.truncf %43 : vector<8x32xf32> to vector<8x32xbf16>
    %cst_26 = arith.constant dense<0.000000e+00> : vector<8x32xf32>
    %61 = tpu.matmul %60, %56, %cst_26 {dimension_numbers = #tpu.dot_dimension_numbers<[1], [1], [0], [0], [0, 0, 1, 0], [], []>} : vector<8x32xbf16>, vector<32x32xbf16>, vector<8x32xf32> -> vector<8x32xf32>
    %62 = arith.addf %61, %2 : vector<8x32xf32>
    %63 = vector.shape_cast %62 : vector<8x32xf32> to vector<8x4x8xf32>
    %cst_27 = arith.constant dense<0xFF800000> : vector<8x4xf32>
    %64 = vector.multi_reduction <maximumf>, %63, %cst_27 [2] : vector<8x4x8xf32> to vector<8x4xf32>
    %65 = vector.shape_cast %64 : vector<8x4xf32> to vector<8x4x1xf32>
    %66 = vector.broadcast %65 : vector<8x4x1xf32> to vector<8x4x8xf32>
    %67 = arith.subf %63, %66 : vector<8x4x8xf32>
    %68 = math.exp %67 : vector<8x4x8xf32>
    %cst_28 = arith.constant dense<0.000000e+00> : vector<8x4xf32>
    %69 = vector.multi_reduction <add>, %68, %cst_28 [2] : vector<8x4x8xf32> to vector<8x4xf32>
    %70 = vector.shape_cast %69 : vector<8x4xf32> to vector<8x4x1xf32>
    %71 = tpu.reciprocal %70 {approx = true} : vector<8x4x1xf32> -> vector<8x4x1xf32>
    %72 = vector.broadcast %71 : vector<8x4x1xf32> to vector<8x4x8xf32>
    %73 = arith.mulf %68, %72 : vector<8x4x8xf32>
    %74 = vector.shape_cast %73 : vector<8x4x8xf32> to vector<8x32xf32>
    %75 = arith.truncf %74 : vector<8x32xf32> to vector<8x32xbf16>
    %cst_29 = arith.constant dense<0.000000e+00> : vector<8x32xf32>
    %76 = tpu.matmul %75, %59, %cst_29 {dimension_numbers = #tpu.dot_dimension_numbers<[1], [0], [0], [1], [0, 0, 1, 1], [], []>} : vector<8x32xbf16>, vector<32x32xbf16>, vector<8x32xf32> -> vector<8x32xf32>
    %c0_30 = arith.constant 0 : index
    %c0_31 = arith.constant 0 : index
    %c0_32 = arith.constant 0 : index
    %77 = vector.load %arg4[%c0_30, %c0_31, %c0_32] : memref<2x32x32xbf16, #tpu.memory_space<vmem>>, vector<1x32x32xbf16>
    %78 = vector.shape_cast %77 : vector<1x32x32xbf16> to vector<32x32xbf16>
    %79 = arith.truncf %76 : vector<8x32xf32> to vector<8x32xbf16>
    %cst_33 = arith.constant dense<0.000000e+00> : vector<8x32xf32>
    %80 = tpu.matmul %79, %78, %cst_33 {dimension_numbers = #tpu.dot_dimension_numbers<[1], [0], [0], [1], [0, 0, 1, 1], [], []>} : vector<8x32xbf16>, vector<32x32xbf16>, vector<8x32xf32> -> vector<8x32xf32>
    %81 = arith.addf %1, %80 : vector<8x32xf32>
    %82 = vector.broadcast %9 : vector<1x32xf32> to vector<8x32xf32>
    %83 = arith.addf %81, %82 : vector<8x32xf32>
    %cst_34 = arith.constant dense<0.000000e+00> : vector<8xf32>
    %84 = vector.multi_reduction <add>, %83, %cst_34 [1] : vector<8x32xf32> to vector<8xf32>
    %85 = vector.shape_cast %84 : vector<8xf32> to vector<8x1xf32>
    %cst_35 = arith.constant 3.200000e+01 : f32
    %86 = vector.broadcast %cst_35 : f32 to vector<8x1xf32>
    %87 = arith.divf %85, %86 : vector<8x1xf32>
    %88 = vector.broadcast %87 : vector<8x1xf32> to vector<8x32xf32>
    %89 = arith.subf %83, %88 : vector<8x32xf32>
    %90 = arith.mulf %89, %89 : vector<8x32xf32>
    %cst_36 = arith.constant dense<0.000000e+00> : vector<8xf32>
    %91 = vector.multi_reduction <add>, %90, %cst_36 [1] : vector<8x32xf32> to vector<8xf32>
    %92 = vector.shape_cast %91 : vector<8xf32> to vector<8x1xf32>
    %cst_37 = arith.constant 3.200000e+01 : f32
    %93 = vector.broadcast %cst_37 : f32 to vector<8x1xf32>
    %94 = arith.divf %92, %93 : vector<8x1xf32>
    %95 = vector.broadcast %87 : vector<8x1xf32> to vector<8x32xf32>
    %96 = arith.subf %83, %95 : vector<8x32xf32>
    %cst_38 = arith.constant 9.99999974E-6 : f32
    %97 = vector.broadcast %cst_38 : f32 to vector<8x1xf32>
    %98 = arith.addf %94, %97 : vector<8x1xf32>
    %99 = math.rsqrt %98 : vector<8x1xf32>
    %100 = vector.broadcast %99 : vector<8x1xf32> to vector<8x32xf32>
    %101 = arith.mulf %96, %100 : vector<8x32xf32>
    %102 = vector.broadcast %14 : vector<1x32xf32> to vector<8x32xf32>
    %103 = arith.mulf %101, %102 : vector<8x32xf32>
    %104 = vector.broadcast %15 : vector<1x32xf32> to vector<8x32xf32>
    %105 = arith.addf %103, %104 : vector<8x32xf32>
    %c0_39 = arith.constant 0 : index
    %c0_40 = arith.constant 0 : index
    %c0_41 = arith.constant 0 : index
    %106 = vector.load %arg5[%c0_39, %c0_40, %c0_41] : memref<2x32x64xbf16, #tpu.memory_space<vmem>>, vector<1x32x64xbf16>
    %107 = vector.shape_cast %106 : vector<1x32x64xbf16> to vector<32x64xbf16>
    %108 = arith.truncf %105 : vector<8x32xf32> to vector<8x32xbf16>
    %cst_42 = arith.constant dense<0.000000e+00> : vector<8x64xf32>
    %109 = tpu.matmul %108, %107, %cst_42 {dimension_numbers = #tpu.dot_dimension_numbers<[1], [0], [0], [1], [0, 0, 1, 1], [], []>} : vector<8x32xbf16>, vector<32x64xbf16>, vector<8x64xf32> -> vector<8x64xf32>
    %110 = vector.broadcast %10 : vector<1x64xf32> to vector<8x64xf32>
    %111 = arith.addf %109, %110 : vector<8x64xf32>
    %112 = arith.mulf %111, %111 : vector<8x64xf32>
    %113 = arith.mulf %111, %112 : vector<8x64xf32>
    %cst_43 = arith.constant 4.471500e-02 : f32
    %114 = vector.broadcast %cst_43 : f32 to vector<8x64xf32>
    %115 = arith.mulf %114, %113 : vector<8x64xf32>
    %116 = arith.addf %111, %115 : vector<8x64xf32>
    %cst_44 = arith.constant 0.797884583 : f32
    %117 = vector.broadcast %cst_44 : f32 to vector<8x64xf32>
    %118 = arith.mulf %117, %116 : vector<8x64xf32>
    %119 = math.tanh %118 : vector<8x64xf32>
    %cst_45 = arith.constant 1.000000e+00 : f32
    %120 = vector.broadcast %cst_45 : f32 to vector<8x64xf32>
    %121 = arith.addf %120, %119 : vector<8x64xf32>
    %cst_46 = arith.constant 5.000000e-01 : f32
    %122 = vector.broadcast %cst_46 : f32 to vector<8x64xf32>
    %123 = arith.mulf %122, %121 : vector<8x64xf32>
    %124 = arith.mulf %111, %123 : vector<8x64xf32>
    %c0_47 = arith.constant 0 : index
    %c0_48 = arith.constant 0 : index
    %c0_49 = arith.constant 0 : index
    %125 = vector.load %arg6[%c0_47, %c0_48, %c0_49] : memref<2x64x32xbf16, #tpu.memory_space<vmem>>, vector<1x64x32xbf16>
    %126 = vector.shape_cast %125 : vector<1x64x32xbf16> to vector<64x32xbf16>
    %127 = arith.truncf %124 : vector<8x64xf32> to vector<8x64xbf16>
    %cst_50 = arith.constant dense<0.000000e+00> : vector<8x32xf32>
    %128 = tpu.matmul %127, %126, %cst_50 {dimension_numbers = #tpu.dot_dimension_numbers<[1], [0], [0], [1], [0, 0, 1, 1], [], []>} : vector<8x64xbf16>, vector<64x32xbf16>, vector<8x32xf32> -> vector<8x32xf32>
    %129 = arith.addf %83, %128 : vector<8x32xf32>
    %130 = vector.broadcast %11 : vector<1x32xf32> to vector<8x32xf32>
    %131 = arith.addf %129, %130 : vector<8x32xf32>
    %c1_51 = arith.constant 1 : index
    %c0_52 = arith.constant 0 : index
    %c0_53 = arith.constant 0 : index
    %132 = vector.load %arg7[%c1_51, %c0_52, %c0_53] : memref<2x10x64xf32, #tpu.memory_space<vmem>>, vector<1x10x64xf32>
    %133 = vector.shape_cast %132 : vector<1x10x64xf32> to vector<10x64xf32>
    %134 = vector.extract_strided_slice %133 {offsets = [0, 0], sizes = [1, 32], strides = [1, 1]} : vector<10x64xf32> to vector<1x32xf32>
    %135 = vector.extract_strided_slice %133 {offsets = [1, 0], sizes = [1, 32], strides = [1, 1]} : vector<10x64xf32> to vector<1x32xf32>
    %136 = vector.extract_strided_slice %133 {offsets = [2, 0], sizes = [1, 32], strides = [1, 1]} : vector<10x64xf32> to vector<1x32xf32>
    %137 = vector.extract_strided_slice %133 {offsets = [3, 0], sizes = [1, 32], strides = [1, 1]} : vector<10x64xf32> to vector<1x32xf32>
    %138 = vector.extract_strided_slice %133 {offsets = [4, 0], sizes = [1, 64], strides = [1, 1]} : vector<10x64xf32> to vector<1x64xf32>
    %139 = vector.extract_strided_slice %133 {offsets = [5, 0], sizes = [1, 32], strides = [1, 1]} : vector<10x64xf32> to vector<1x32xf32>
    %140 = vector.extract_strided_slice %133 {offsets = [6, 0], sizes = [1, 32], strides = [1, 1]} : vector<10x64xf32> to vector<1x32xf32>
    %141 = vector.extract_strided_slice %133 {offsets = [7, 0], sizes = [1, 32], strides = [1, 1]} : vector<10x64xf32> to vector<1x32xf32>
    %142 = vector.extract_strided_slice %133 {offsets = [8, 0], sizes = [1, 32], strides = [1, 1]} : vector<10x64xf32> to vector<1x32xf32>
    %143 = vector.extract_strided_slice %133 {offsets = [9, 0], sizes = [1, 32], strides = [1, 1]} : vector<10x64xf32> to vector<1x32xf32>
    %cst_54 = arith.constant dense<0.000000e+00> : vector<8xf32>
    %144 = vector.multi_reduction <add>, %131, %cst_54 [1] : vector<8x32xf32> to vector<8xf32>
    %145 = vector.shape_cast %144 : vector<8xf32> to vector<8x1xf32>
    %cst_55 = arith.constant 3.200000e+01 : f32
    %146 = vector.broadcast %cst_55 : f32 to vector<8x1xf32>
    %147 = arith.divf %145, %146 : vector<8x1xf32>
    %148 = vector.broadcast %147 : vector<8x1xf32> to vector<8x32xf32>
    %149 = arith.subf %131, %148 : vector<8x32xf32>
    %150 = arith.mulf %149, %149 : vector<8x32xf32>
    %cst_56 = arith.constant dense<0.000000e+00> : vector<8xf32>
    %151 = vector.multi_reduction <add>, %150, %cst_56 [1] : vector<8x32xf32> to vector<8xf32>
    %152 = vector.shape_cast %151 : vector<8xf32> to vector<8x1xf32>
    %cst_57 = arith.constant 3.200000e+01 : f32
    %153 = vector.broadcast %cst_57 : f32 to vector<8x1xf32>
    %154 = arith.divf %152, %153 : vector<8x1xf32>
    %155 = vector.broadcast %147 : vector<8x1xf32> to vector<8x32xf32>
    %156 = arith.subf %131, %155 : vector<8x32xf32>
    %cst_58 = arith.constant 9.99999974E-6 : f32
    %157 = vector.broadcast %cst_58 : f32 to vector<8x1xf32>
    %158 = arith.addf %154, %157 : vector<8x1xf32>
    %159 = math.rsqrt %158 : vector<8x1xf32>
    %160 = vector.broadcast %159 : vector<8x1xf32> to vector<8x32xf32>
    %161 = arith.mulf %156, %160 : vector<8x32xf32>
    %162 = vector.broadcast %140 : vector<1x32xf32> to vector<8x32xf32>
    %163 = arith.mulf %161, %162 : vector<8x32xf32>
    %164 = vector.broadcast %141 : vector<1x32xf32> to vector<8x32xf32>
    %165 = arith.addf %163, %164 : vector<8x32xf32>
    %166 = arith.truncf %165 : vector<8x32xf32> to vector<8x32xbf16>
    %c1_59 = arith.constant 1 : index
    %c0_60 = arith.constant 0 : index
    %c0_61 = arith.constant 0 : index
    %c0_62 = arith.constant 0 : index
    %167 = vector.load %arg3[%c1_59, %c0_60, %c0_61, %c0_62] : memref<2x3x32x32xbf16, #tpu.memory_space<vmem>>, vector<1x1x32x32xbf16>
    %168 = vector.shape_cast %167 : vector<1x1x32x32xbf16> to vector<32x32xbf16>
    %cst_63 = arith.constant dense<0.000000e+00> : vector<8x32xf32>
    %169 = tpu.matmul %166, %168, %cst_63 {dimension_numbers = #tpu.dot_dimension_numbers<[1], [0], [0], [1], [0, 0, 1, 1], [], []>} : vector<8x32xbf16>, vector<32x32xbf16>, vector<8x32xf32> -> vector<8x32xf32>
    %170 = vector.broadcast %134 : vector<1x32xf32> to vector<8x32xf32>
    %171 = arith.addf %169, %170 : vector<8x32xf32>
    %c1_64 = arith.constant 1 : index
    %c1_65 = arith.constant 1 : index
    %c0_66 = arith.constant 0 : index
    %c0_67 = arith.constant 0 : index
    %172 = vector.load %arg3[%c1_64, %c1_65, %c0_66, %c0_67] : memref<2x3x32x32xbf16, #tpu.memory_space<vmem>>, vector<1x1x32x32xbf16>
    %173 = vector.shape_cast %172 : vector<1x1x32x32xbf16> to vector<32x32xbf16>
    %cst_68 = arith.constant dense<0.000000e+00> : vector<8x32xf32>
    %174 = tpu.matmul %166, %173, %cst_68 {dimension_numbers = #tpu.dot_dimension_numbers<[1], [0], [0], [1], [0, 0, 1, 1], [], []>} : vector<8x32xbf16>, vector<32x32xbf16>, vector<8x32xf32> -> vector<8x32xf32>
    %175 = vector.broadcast %135 : vector<1x32xf32> to vector<8x32xf32>
    %176 = arith.addf %174, %175 : vector<8x32xf32>
    %c1_69 = arith.constant 1 : index
    %c2_70 = arith.constant 2 : index
    %c0_71 = arith.constant 0 : index
    %c0_72 = arith.constant 0 : index
    %177 = vector.load %arg3[%c1_69, %c2_70, %c0_71, %c0_72] : memref<2x3x32x32xbf16, #tpu.memory_space<vmem>>, vector<1x1x32x32xbf16>
    %178 = vector.shape_cast %177 : vector<1x1x32x32xbf16> to vector<32x32xbf16>
    %cst_73 = arith.constant dense<0.000000e+00> : vector<8x32xf32>
    %179 = tpu.matmul %166, %178, %cst_73 {dimension_numbers = #tpu.dot_dimension_numbers<[1], [0], [0], [1], [0, 0, 1, 1], [], []>} : vector<8x32xbf16>, vector<32x32xbf16>, vector<8x32xf32> -> vector<8x32xf32>
    %180 = vector.broadcast %136 : vector<1x32xf32> to vector<8x32xf32>
    %181 = arith.addf %179, %180 : vector<8x32xf32>
    %182 = tpu.concatenate %176, %176, %176, %176 in 0 : vector<8x32xf32>, vector<8x32xf32>, vector<8x32xf32>, vector<8x32xf32> -> vector<32x32xf32>
    %183 = arith.mulf %182, %3 : vector<32x32xf32>
    %184 = arith.truncf %183 : vector<32x32xf32> to vector<32x32xbf16>
    %185 = tpu.concatenate %181, %181, %181, %181 in 0 : vector<8x32xf32>, vector<8x32xf32>, vector<8x32xf32>, vector<8x32xf32> -> vector<32x32xf32>
    %186 = arith.mulf %185, %3 : vector<32x32xf32>
    %187 = arith.truncf %186 : vector<32x32xf32> to vector<32x32xbf16>
    %188 = arith.truncf %171 : vector<8x32xf32> to vector<8x32xbf16>
    %cst_74 = arith.constant dense<0.000000e+00> : vector<8x32xf32>
    %189 = tpu.matmul %188, %184, %cst_74 {dimension_numbers = #tpu.dot_dimension_numbers<[1], [1], [0], [0], [0, 0, 1, 0], [], []>} : vector<8x32xbf16>, vector<32x32xbf16>, vector<8x32xf32> -> vector<8x32xf32>
    %190 = arith.addf %189, %2 : vector<8x32xf32>
    %191 = vector.shape_cast %190 : vector<8x32xf32> to vector<8x4x8xf32>
    %cst_75 = arith.constant dense<0xFF800000> : vector<8x4xf32>
    %192 = vector.multi_reduction <maximumf>, %191, %cst_75 [2] : vector<8x4x8xf32> to vector<8x4xf32>
    %193 = vector.shape_cast %192 : vector<8x4xf32> to vector<8x4x1xf32>
    %194 = vector.broadcast %193 : vector<8x4x1xf32> to vector<8x4x8xf32>
    %195 = arith.subf %191, %194 : vector<8x4x8xf32>
    %196 = math.exp %195 : vector<8x4x8xf32>
    %cst_76 = arith.constant dense<0.000000e+00> : vector<8x4xf32>
    %197 = vector.multi_reduction <add>, %196, %cst_76 [2] : vector<8x4x8xf32> to vector<8x4xf32>
    %198 = vector.shape_cast %197 : vector<8x4xf32> to vector<8x4x1xf32>
    %199 = tpu.reciprocal %198 {approx = true} : vector<8x4x1xf32> -> vector<8x4x1xf32>
    %200 = vector.broadcast %199 : vector<8x4x1xf32> to vector<8x4x8xf32>
    %201 = arith.mulf %196, %200 : vector<8x4x8xf32>
    %202 = vector.shape_cast %201 : vector<8x4x8xf32> to vector<8x32xf32>
    %203 = arith.truncf %202 : vector<8x32xf32> to vector<8x32xbf16>
    %cst_77 = arith.constant dense<0.000000e+00> : vector<8x32xf32>
    %204 = tpu.matmul %203, %187, %cst_77 {dimension_numbers = #tpu.dot_dimension_numbers<[1], [0], [0], [1], [0, 0, 1, 1], [], []>} : vector<8x32xbf16>, vector<32x32xbf16>, vector<8x32xf32> -> vector<8x32xf32>
    %c1_78 = arith.constant 1 : index
    %c0_79 = arith.constant 0 : index
    %c0_80 = arith.constant 0 : index
    %205 = vector.load %arg4[%c1_78, %c0_79, %c0_80] : memref<2x32x32xbf16, #tpu.memory_space<vmem>>, vector<1x32x32xbf16>
    %206 = vector.shape_cast %205 : vector<1x32x32xbf16> to vector<32x32xbf16>
    %207 = arith.truncf %204 : vector<8x32xf32> to vector<8x32xbf16>
    %cst_81 = arith.constant dense<0.000000e+00> : vector<8x32xf32>
    %208 = tpu.matmul %207, %206, %cst_81 {dimension_numbers = #tpu.dot_dimension_numbers<[1], [0], [0], [1], [0, 0, 1, 1], [], []>} : vector<8x32xbf16>, vector<32x32xbf16>, vector<8x32xf32> -> vector<8x32xf32>
    %209 = arith.addf %131, %208 : vector<8x32xf32>
    %210 = vector.broadcast %137 : vector<1x32xf32> to vector<8x32xf32>
    %211 = arith.addf %209, %210 : vector<8x32xf32>
    %cst_82 = arith.constant dense<0.000000e+00> : vector<8xf32>
    %212 = vector.multi_reduction <add>, %211, %cst_82 [1] : vector<8x32xf32> to vector<8xf32>
    %213 = vector.shape_cast %212 : vector<8xf32> to vector<8x1xf32>
    %cst_83 = arith.constant 3.200000e+01 : f32
    %214 = vector.broadcast %cst_83 : f32 to vector<8x1xf32>
    %215 = arith.divf %213, %214 : vector<8x1xf32>
    %216 = vector.broadcast %215 : vector<8x1xf32> to vector<8x32xf32>
    %217 = arith.subf %211, %216 : vector<8x32xf32>
    %218 = arith.mulf %217, %217 : vector<8x32xf32>
    %cst_84 = arith.constant dense<0.000000e+00> : vector<8xf32>
    %219 = vector.multi_reduction <add>, %218, %cst_84 [1] : vector<8x32xf32> to vector<8xf32>
    %220 = vector.shape_cast %219 : vector<8xf32> to vector<8x1xf32>
    %cst_85 = arith.constant 3.200000e+01 : f32
    %221 = vector.broadcast %cst_85 : f32 to vector<8x1xf32>
    %222 = arith.divf %220, %221 : vector<8x1xf32>
    %223 = vector.broadcast %215 : vector<8x1xf32> to vector<8x32xf32>
    %224 = arith.subf %211, %223 : vector<8x32xf32>
    %cst_86 = arith.constant 9.99999974E-6 : f32
    %225 = vector.broadcast %cst_86 : f32 to vector<8x1xf32>
    %226 = arith.addf %222, %225 : vector<8x1xf32>
    %227 = math.rsqrt %226 : vector<8x1xf32>
    %228 = vector.broadcast %227 : vector<8x1xf32> to vector<8x32xf32>
    %229 = arith.mulf %224, %228 : vector<8x32xf32>
    %230 = vector.broadcast %142 : vector<1x32xf32> to vector<8x32xf32>
    %231 = arith.mulf %229, %230 : vector<8x32xf32>
    %232 = vector.broadcast %143 : vector<1x32xf32> to vector<8x32xf32>
    %233 = arith.addf %231, %232 : vector<8x32xf32>
    %c1_87 = arith.constant 1 : index
    %c0_88 = arith.constant 0 : index
    %c0_89 = arith.constant 0 : index
    %234 = vector.load %arg5[%c1_87, %c0_88, %c0_89] : memref<2x32x64xbf16, #tpu.memory_space<vmem>>, vector<1x32x64xbf16>
    %235 = vector.shape_cast %234 : vector<1x32x64xbf16> to vector<32x64xbf16>
    %236 = arith.truncf %233 : vector<8x32xf32> to vector<8x32xbf16>
    %cst_90 = arith.constant dense<0.000000e+00> : vector<8x64xf32>
    %237 = tpu.matmul %236, %235, %cst_90 {dimension_numbers = #tpu.dot_dimension_numbers<[1], [0], [0], [1], [0, 0, 1, 1], [], []>} : vector<8x32xbf16>, vector<32x64xbf16>, vector<8x64xf32> -> vector<8x64xf32>
    %238 = vector.broadcast %138 : vector<1x64xf32> to vector<8x64xf32>
    %239 = arith.addf %237, %238 : vector<8x64xf32>
    %240 = arith.mulf %239, %239 : vector<8x64xf32>
    %241 = arith.mulf %239, %240 : vector<8x64xf32>
    %cst_91 = arith.constant 4.471500e-02 : f32
    %242 = vector.broadcast %cst_91 : f32 to vector<8x64xf32>
    %243 = arith.mulf %242, %241 : vector<8x64xf32>
    %244 = arith.addf %239, %243 : vector<8x64xf32>
    %cst_92 = arith.constant 0.797884583 : f32
    %245 = vector.broadcast %cst_92 : f32 to vector<8x64xf32>
    %246 = arith.mulf %245, %244 : vector<8x64xf32>
    %247 = math.tanh %246 : vector<8x64xf32>
    %cst_93 = arith.constant 1.000000e+00 : f32
    %248 = vector.broadcast %cst_93 : f32 to vector<8x64xf32>
    %249 = arith.addf %248, %247 : vector<8x64xf32>
    %cst_94 = arith.constant 5.000000e-01 : f32
    %250 = vector.broadcast %cst_94 : f32 to vector<8x64xf32>
    %251 = arith.mulf %250, %249 : vector<8x64xf32>
    %252 = arith.mulf %239, %251 : vector<8x64xf32>
    %c1_95 = arith.constant 1 : index
    %c0_96 = arith.constant 0 : index
    %c0_97 = arith.constant 0 : index
    %253 = vector.load %arg6[%c1_95, %c0_96, %c0_97] : memref<2x64x32xbf16, #tpu.memory_space<vmem>>, vector<1x64x32xbf16>
    %254 = vector.shape_cast %253 : vector<1x64x32xbf16> to vector<64x32xbf16>
    %255 = arith.truncf %252 : vector<8x64xf32> to vector<8x64xbf16>
    %cst_98 = arith.constant dense<0.000000e+00> : vector<8x32xf32>
    %256 = tpu.matmul %255, %254, %cst_98 {dimension_numbers = #tpu.dot_dimension_numbers<[1], [0], [0], [1], [0, 0, 1, 1], [], []>} : vector<8x64xbf16>, vector<64x32xbf16>, vector<8x32xf32> -> vector<8x32xf32>
    %257 = arith.addf %211, %256 : vector<8x32xf32>
    %258 = vector.broadcast %139 : vector<1x32xf32> to vector<8x32xf32>
    %259 = arith.addf %257, %258 : vector<8x32xf32>
    %c0_99 = arith.constant 0 : index
    %c0_100 = arith.constant 0 : index
    %260 = vector.load %arg13[%c0_99, %c0_100] : memref<8x32xf32, #tpu.memory_space<vmem>>, vector<8x32xf32>
    tpu.vector_store %arg13[%c0_99, %c0_100], %259 {strides = array<i32>} : memref<8x32xf32, #tpu.memory_space<vmem>>, vector<8x32xf32>,
    %c0_101 = arith.constant 0 : index
    %261 = memref.load %arg1[%c0_101] : memref<2xi32, #tpu.memory_space<smem>>
    %262 = arith.index_cast %261 : i32 to index
    %c0_102 = arith.constant 0 : index
    %263 = vector.load %arg13[%262, %c0_102] : memref<8x32xf32, #tpu.memory_space<vmem>>, vector<1x32xf32>
    %c0_103 = arith.constant 0 : index
    %c0_104 = arith.constant 0 : index
    %264 = vector.load %arg10[%c0_103, %c0_104] : memref<2x32xf32, #tpu.memory_space<vmem>>, vector<2x32xf32>
    %265 = vector.extract_strided_slice %264 {offsets = [0, 0], sizes = [1, 32], strides = [1, 1]} : vector<2x32xf32> to vector<1x32xf32>
    %266 = vector.extract_strided_slice %264 {offsets = [1, 0], sizes = [1, 32], strides = [1, 1]} : vector<2x32xf32> to vector<1x32xf32>
    %cst_105 = arith.constant dense<0.000000e+00> : vector<1xf32>
    %267 = vector.multi_reduction <add>, %263, %cst_105 [1] : vector<1x32xf32> to vector<1xf32>
    %268 = vector.shape_cast %267 : vector<1xf32> to vector<1x1xf32>
    %cst_106 = arith.constant 3.200000e+01 : f32
    %269 = vector.broadcast %cst_106 : f32 to vector<1x1xf32>
    %270 = arith.divf %268, %269 : vector<1x1xf32>
    %271 = vector.broadcast %270 : vector<1x1xf32> to vector<1x32xf32>
    %272 = arith.subf %263, %271 : vector<1x32xf32>
    %273 = arith.mulf %272, %272 : vector<1x32xf32>
    %cst_107 = arith.constant dense<0.000000e+00> : vector<1xf32>
    %274 = vector.multi_reduction <add>, %273, %cst_107 [1] : vector<1x32xf32> to vector<1xf32>
    %275 = vector.shape_cast %274 : vector<1xf32> to vector<1x1xf32>
    %cst_108 = arith.constant 3.200000e+01 : f32
    %276 = vector.broadcast %cst_108 : f32 to vector<1x1xf32>
    %277 = arith.divf %275, %276 : vector<1x1xf32>
    %278 = vector.broadcast %270 : vector<1x1xf32> to vector<1x32xf32>
    %279 = arith.subf %263, %278 : vector<1x32xf32>
    %cst_109 = arith.constant 9.99999974E-6 : f32
    %280 = vector.broadcast %cst_109 : f32 to vector<1x1xf32>
    %281 = arith.addf %277, %280 : vector<1x1xf32>
    %282 = math.rsqrt %281 : vector<1x1xf32>
    %283 = vector.broadcast %282 : vector<1x1xf32> to vector<1x32xf32>
    %284 = arith.mulf %279, %283 : vector<1x32xf32>
    %285 = arith.mulf %284, %265 : vector<1x32xf32>
    %286 = arith.addf %285, %266 : vector<1x32xf32>
    %c0_110 = arith.constant 0 : index
    %c0_111 = arith.constant 0 : index
    %287 = vector.load %arg11[%c0_110, %c0_111] : memref<32x128xbf16, #tpu.memory_space<vmem>>, vector<32x128xbf16>
    %288 = arith.truncf %286 : vector<1x32xf32> to vector<1x32xbf16>
    %cst_112 = arith.constant dense<0.000000e+00> : vector<1x128xf32>
    %289 = tpu.matmul %288, %287, %cst_112 {dimension_numbers = #tpu.dot_dimension_numbers<[1], [0], [0], [1], [0, 0, 1, 1], [], []>} : vector<1x32xbf16>, vector<32x128xbf16>, vector<1x128xf32> -> vector<1x128xf32>
    %c0_113 = arith.constant 0 : index
    %c0_114 = arith.constant 0 : index
    %c0_115 = arith.constant 0 : index
    %290 = vector.load %arg12[%c0_113, %c0_114, %c0_115] : memref<1x1x128xf32, #tpu.memory_space<vmem>>, vector<1x1x128xf32>
    %291 = vector.shape_cast %290 : vector<1x1x128xf32> to vector<1x128xf32>
    %292 = vector.shape_cast %289 : vector<1x128xf32> to vector<1x1x128xf32>
    tpu.vector_store %arg12[%c0_113, %c0_114, %c0_115], %292 {strides = array<i32>} : memref<1x1x128xf32, #tpu.memory_space<vmem>>, vector<1x1x128xf32>,
    return
  }
  func.func @transform_0(%arg0: i32, %arg1: memref<2xi32, #tpu.memory_space<smem>>) -> (i32, i32, i32) {
    %c0_i32 = arith.constant 0 : i32
    %c0_i32_0 = arith.constant 0 : i32
    %c0_i32_1 = arith.constant 0 : i32
    return %arg0, %c0_i32, %c0_i32_0 : i32, i32, i32
  }
  func.func @transform_1(%arg0: i32, %arg1: memref<2xi32, #tpu.memory_space<smem>>) -> (i32, i32, i32, i32) {
    %c0_i32 = arith.constant 0 : i32
    %c0_i32_0 = arith.constant 0 : i32
    %c0_i32_1 = arith.constant 0 : i32
    %c0_i32_2 = arith.constant 0 : i32
    %c0_i32_3 = arith.constant 0 : i32
    return %c0_i32, %c0_i32_0, %c0_i32_1, %c0_i32_2 : i32, i32, i32, i32
  }
  func.func @transform_2(%arg0: i32, %arg1: memref<2xi32, #tpu.memory_space<smem>>) -> (i32, i32, i32) {
    %c0_i32 = arith.constant 0 : i32
    %c0_i32_0 = arith.constant 0 : i32
    %c0_i32_1 = arith.constant 0 : i32
    %c0_i32_2 = arith.constant 0 : i32
    return %c0_i32, %c0_i32_0, %c0_i32_1 : i32, i32, i32
  }
  func.func @transform_3(%arg0: i32, %arg1: memref<2xi32, #tpu.memory_space<smem>>) -> (i32, i32, i32) {
    %c0_i32 = arith.constant 0 : i32
    %c0_i32_0 = arith.constant 0 : i32
    %c0_i32_1 = arith.constant 0 : i32
    %c0_i32_2 = arith.constant 0 : i32
    return %c0_i32, %c0_i32_0, %c0_i32_1 : i32, i32, i32
  }
  func.func @transform_4(%arg0: i32, %arg1: memref<2xi32, #tpu.memory_space<smem>>) -> (i32, i32, i32) {
    %c0_i32 = arith.constant 0 : i32
    %c0_i32_0 = arith.constant 0 : i32
    %c0_i32_1 = arith.constant 0 : i32
    %c0_i32_2 = arith.constant 0 : i32
    return %c0_i32, %c0_i32_0, %c0_i32_1 : i32, i32, i32
  }
  func.func @transform_5(%arg0: i32, %arg1: memref<2xi32, #tpu.memory_space<smem>>) -> (i32, i32, i32) {
    %c0_i32 = arith.constant 0 : i32
    %c0_i32_0 = arith.constant 0 : i32
    %c0_i32_1 = arith.constant 0 : i32
    %c0_i32_2 = arith.constant 0 : i32
    return %c0_i32, %c0_i32_0, %c0_i32_1 : i32, i32, i32
  }
  func.func @transform_6(%arg0: i32, %arg1: memref<2xi32, #tpu.memory_space<smem>>) -> (i32, i32) {
    %c0_i32 = arith.constant 0 : i32
    %c0_i32_0 = arith.constant 0 : i32
    %c0_i32_1 = arith.constant 0 : i32
    return %c0_i32, %c0_i32_0 : i32, i32
  }
  func.func @transform_7(%arg0: i32, %arg1: memref<2xi32, #tpu.memory_space<smem>>) -> (i32, i32) {
    %c0_i32 = arith.constant 0 : i32
    %c0_i32_0 = arith.constant 0 : i32
    %c0_i32_1 = arith.constant 0 : i32
    return %c0_i32, %c0_i32_0 : i32, i32
  }
  func.func @transform_8(%arg0: i32, %arg1: memref<2xi32, #tpu.memory_space<smem>>) -> (i32, i32) {
    %c0_i32 = arith.constant 0 : i32
    %c0_i32_0 = arith.constant 0 : i32
    %c0_i32_1 = arith.constant 0 : i32
    return %c0_i32, %c0_i32_0 : i32, i32
  }
  func.func @transform_9(%arg0: i32, %arg1: memref<2xi32, #tpu.memory_space<smem>>) -> (i32, i32) {
    %c0_i32 = arith.constant 0 : i32
    %c0_i32_0 = arith.constant 0 : i32
    %c0_i32_1 = arith.constant 0 : i32
    return %c0_i32, %c0_i32_0 : i32, i32
  }
  func.func @transform_10(%arg0: i32, %arg1: memref<2xi32, #tpu.memory_space<smem>>) -> (i32, i32, i32) {
    %c0_i32 = arith.constant 0 : i32
    %c0_i32_0 = arith.constant 0 : i32
    %c0_i32_1 = arith.constant 0 : i32
    return %arg0, %c0_i32, %c0_i32_0 : i32, i32, i32
  }
}

</mosaic_0001>

<bundles_post_ra>
// kernel: tpu_custom_call.1
= control target key start
LH: loop header
LB: loop body
LE: loop exit
PB: predicated region body
PF: predicated region fallthrough
CT: control target
= control target key end

     0   :  { %s2345_s20 = smov [#allocation4]   ;;  %s2896_s0 = inlined_call_operand.hbm [shape: s32[2], index: 0, kind: input, shape index: {}]   ;;  %s2897_s1 = inlined_call_operand.vmem [shape: f32[2,8,32], index: 1, kind: input, shape index: {}]   ;;  %s2898_s2 = inlined_call_operand.vmem [shape: bf16[2,3,32,32], index: 2, kind: input, shape index: {}]   ;;  %s2899_s3 = inlined_call_operand.hbm [shape: bf16[2,32,32], index: 3, kind: input, shape index: {}]   ;;  %s2900_s4 = inlined_call_operand.hbm [shape: bf16[2,32,64], index: 4, kind: input, shape index: {}]   ;;  %s2901_s5 = inlined_call_operand.vmem [shape: bf16[2,64,32], index: 5, kind: input, shape index: {}]   ;;  %s2902_s6 = inlined_call_operand.vmem [shape: f32[2,10,64], index: 6, kind: input, shape index: {}]   ;;  %s2903_s7 = inlined_call_operand.vmem [shape: f32[8,32], index: 7, kind: input, shape index: {}]   ;;  %s2904_s8 = inlined_call_operand.hbm [shape: f32[32,32], index: 8, kind: input, shape index: {}]   ;;  %s2905_s9 = inlined_call_operand.vmem [shape: f32[2,32], index: 9, kind: input, shape index: {}]   ;;  %s2906_s10 = inlined_call_operand.hbm [shape: bf16[32,128], index: 10, kind: input, shape index: {}]   ;;  %s2907_s11 = inlined_call_operand.hbm [shape: f32[2,1,128], index: 11, kind: output, shape index: {}]  }
   0x1   :  { %2913 = sst [smem:[#allocation24_spill]] %s2899_s3  ;;  %s17_s19 = sshll.u32 %s2896_s0, 4  ;;  %s18_s19 = int_to_ptr.hbm [resolvable:$true] %s17_s19 }
   0x2   :  { %2914 = sst [smem:[#allocation25_spill]] %s2900_s4 }
   0x3   :  { %20 = dma.hbm_to_smem %s18_s19, 16, %s2345_s20, [#allocation3] }
   0x4   :  { %2311 = dma.done.wait [#allocation3], 16 }
   0x5   :  { %2312 = vsyncadd [#allocation3], 4294967280 }
   0x6   :  { %23 = sfence }
   0x7   :  { %24 = vsyncpa [#allocation6], 0 }
   0x8   :  { %25 = vsyncpa [#allocation9], 0 }
   0x9   :  { %26 = vsyncpa [#allocation12], 0 }
   0xa   :  { %27 = vsyncpa [#allocation7], 0 }
   0xb   :  { %29 = vsyncpa [#allocation7 + $0x1], 0  ;;  %s2426_s21 = smov 0   ;;  %s2428_s22 = smov 0  }
   0xc   :  { %s2430_s23 = smov 0   ;;  %s2432_s24 = smov 0  }
   0xd LB: > { %2915 = sst [smem:[#allocation19_spill]] %s2331_s21  ;;  %s2447_s0 = sadd.s32 4294967295, %s2343_s24   ;;  %s2343_s24 = sphi %s2432_s24, %s2928_s24   ;;  %s2339_s23 = sphi %s2430_s23, %s2930_s23   ;;  %s2335_s22 = sphi %s2428_s22, %s2932_s22   ;;  %s2331_s21 = sphi %s2426_s21, %s2931_s21  }
   0xe   : > { %2916 = sst [smem:[#allocation20_spill]] %s2339_s23  ;;  %s1749_s25 = sadd.s32 4294967294, %s2343_s24  }
   0xf   : > { %s2451_s26 = sadd.s32 1, %s2343_s24   ;;  %s257_s27 = sadd.s32 1, %s2339_s23 }
  0x10   : > { %2917 = sst [smem:[#allocation21_spill]] %s2451_s26  ;;  %s254_s28 = ssub.s32 %s2343_s24, %s2451_s26 }
  0x11   : > { %p267_p0 = scmp.ne.s32.totalorder %s2339_s23, %s2335_s22  ;;  %p255_p1 = scmp.eq.s32.totalorder %s254_s28, 0 }
  0x12   : > { %p268_p2 = scmp.eq.s32.totalorder %s2447_s0, 1  ;;  %p273_p3 = scmp.ne.s32.totalorder %s2335_s22, %s2331_s21 }
  0x13   : > { %p274_p4 = scmp.eq.s32.totalorder %s1749_s25, 1  ;;  %p1750_p7 = scmp.ge.s32.totalorder %s2343_s24, 1 }
  0x14   : > { %s2462_s29 = scalar_select %p255_p1, %s2339_s23, %s257_s27  }
  0x15   : > { %p2464_p5 = por %p268_p2, %p267_p0  ;;  %p2468_p6 = por %p274_p4, %p273_p3 }
  0x16   : > { %2918 = sst [smem:[#allocation22_spill]] %s2462_s29  ;;  %p281_p8 = scmp.lt.s32.totalorder %s2343_s24, 3 }
  0x17   : > { %s2920_s12 = scalar_select %p2468_p6, 1, 0 }
  0x18   : > { %p1996_p9 = scmp.eq.s32.totalorder %s2447_s0, 0  ;;  %p2475_p10 = pnand %p1750_p7, %p281_p8 }
  0x19   : > { %2921 = sst [smem:[#allocation23_spill]] %s2920_s12  ;;  %s2346_s25 = smov [#allocation8]  }
  0x1a   : > { %s2923_s4 = sld [smem:[#allocation25_spill]]  ;;  %p1979_p11 = pneg %p2475_p10 }
  0x1b   : > { %s2924_s3 = sld [smem:[#allocation24_spill]]  ;;  %s311_s27 = sshll.u32 %s2346_s25, 4  ;;  %s312_s27 = int_to_ptr.vmem [resolvable:$true] %s311_s27 }
  0x1c   : > { %p2489_p12 = pnand %p1996_p9, %p1979_p11  ;;  %s2347_s28 = smov 64  }
  0x1d   : > { %s2348_s14 = smov 4   ;;  %s2349_s15 = smov [#allocation5]  }
  0x1e   : > { %s2350_s29 = smov [#allocation10]   ;;  %s349_s12 = sshll.u32 %s2906_s10, 4  ;;  %s350_s12 = int_to_ptr.hbm [resolvable:$true] %s349_s12 }
  0x1f   : > { %s334_s25 = sshll.u32 %s2350_s29, 4  ;;  %s2351_s21 = smov 128   ;;  %s335_s25 = int_to_ptr.vmem [resolvable:$true] %s334_s25 }
  0x20   : > { %s309_s16 = sshll.u32 %s2923_s4, 4  ;;  %s297_s4 = sshll.u32 %s2349_s15, 4  ;;  %s310_s16 = int_to_ptr.hbm [resolvable:$true] %s309_s16  ;;  %s298_s4 = int_to_ptr.vmem [resolvable:$true] %s297_s4 }
  0x21   : > { %s295_s19 = sshll.u32 %s2924_s3, 4  ;;  %s332_s3 = sshll.u32 %s2904_s8, 4  ;;  %s296_s19 = int_to_ptr.hbm [resolvable:$true] %s295_s19  ;;  %s333_s3 = int_to_ptr.hbm [resolvable:$true] %s332_s3 }
  0x22   : > { %1985 = dma.hbm_to_vmem [thread:$0]  (!%p2489_p12), %s310_s16, 512, %s312_s27, [#allocation9], %s2347_s28, %s2347_s28, %s2348_s14  }
  0x23   : > { %1982 = dma.hbm_to_vmem [thread:$0]  (!%p2489_p12), %s296_s19, 512, %s298_s4, [#allocation6], %s2347_s28, %s2347_s28, %s2348_s14  }
  0x24   : > { %s2352_s16 = smov 8   ;;  %s2353_s27 = smov [#allocation11]  }
  0x25   : > { %1988 = dma.hbm_to_vmem [thread:$0]  (!%p2489_p12), %s333_s3, 512, %s335_s25, [#allocation9], %s2351_s21, %s2351_s21, %s2352_s16  }
  0x26   : > { %s351_s15 = sshll.u32 %s2353_s27, 4  ;;  %374 = sbr.rel (%p2475_p10) target bundleno = 4288 (0x10c0), region = 60  ;;  %s352_s15 = int_to_ptr.vmem [resolvable:$true] %s351_s15 }
  0x27   : > { %1991 = dma.hbm_to_vmem [thread:$0]  (!%p2489_p12), %s350_s12, 256, %s352_s15, [#allocation12], %s2347_s28, %s2347_s28, %s2348_s14  }
  0x2b   : > { %2314 = dma.done.wait (%p1996_p9), [#allocation6], 512  }
  0x2c   : > { %2316 = vsyncadd (%p1996_p9), [#allocation6], 4294966784 }
  0x2d   : > { %2318 = dma.done.wait (%p1996_p9), [#allocation9], 1024  }
  0x2e   : > { %2320 = vsyncadd (%p1996_p9), [#allocation9], 4294966272 }
  0x2f   : > { %2322 = dma.done.wait (%p1996_p9), [#allocation12], 256  }
  0x30   : > { %2324 = vsyncadd (%p1996_p9), [#allocation12], 4294967040  ;;  %p426_p13 = scmp.lt.s32.totalorder %s2447_s0, 1  ;;  %vm439_vm0 = vcmask 261120   ;;  %v2354_v2 = vmov 32.0   ;;  %v1932_v14 = vld [vmem:[%s2898_s2 + $0x8] sm:$0xff]  ;;  %s1648_s21 = scalar_lea.hbm %s2907_s11, %s2447_s0 }
  0x31   : > { %2055 = vrcp.f32 %v2354_v2  ;;  %v1934_v15 = vld [vmem:[%s2898_s2 + $0x18] sm:$0xff]  ;;  %v1936_v16 = vld [vmem:[%s2898_s2 + $0x28] sm:$0xff]  ;;  %500 = vmatpush.bf16.msra.mxu0 %v1932_v14  ;;  %v1931_v17 = vld [vmem:[%s2898_s2] sm:$0xff]  ;;  %s2355_s23 = smov 120   ;;  %s2357_s29 = smov 104   ;;  %vm615_vm5 = vcmask 1047556  }
  0x32   : > { %s427_s3 = scalar_select %p426_p13, %s2447_s0, 1  ;;  %531 = vmatpush.bf16.msra.mxu1 %v1934_v15  ;;  %v1933_v18 = vld [vmem:[%s2898_s2 + $0x10] sm:$0xff]  ;;  %562 = vmatpush.bf16.msra.mxu2 %v1936_v16  ;;  %v1935_v19 = vld [vmem:[%s2898_s2 + $0x20] sm:$0xff]  ;;  %v2565_v40 = vld [vmem:[#allocation10 + $0x10] sm:$0xff]  ;;  %vm671_vm6 = vcmask 60416   ;;  %vm828_vm7 = vcmask 64512  }
  0x33   : > { %v2557_v28 = vld [vmem:[%s2902_s6] sm:$0xff]  ;;  %v2572_v46 = vld [vmem:[#allocation10] sm:$0xff]  ;;  %v2574_v47 = vld [vmem:[#allocation10 + $0x8] sm:$0xff]  ;;  %s2360_s12 = smov 16   ;;  %s2361_s13 = smov 8   ;;  %vm830_vm8 = vcmask 130048  }
  0x34   : > { %s1761_s4 = sshll.u32 %s427_s3, 3  ;;  %v469_v30 = vperm.slane %v2557_v28, 6  ;;  %v471_v33 = vperm.slane %v2557_v28, 7  ;;  %v512_v37 = vperm.slane %v2557_v28, 1  ;;  %v2567_v41 = vld [vmem:[#allocation10 + $0x18] sm:$0xff]  ;;  %v543_v45 = vperm.slane %v2557_v28, 2 }
  0x35   : > { %s429_s26 = scalar_lea.vmem %s2897_s1, %s1761_s4  ;;  %501 = vmatpush.bf16.msra.mxu0 %v1931_v17  ;;  %v478_v62 = vperm.slane %v2557_v28, 0  ;;  %s2362_s19 = smov 24   ;;  %vm832_vm9 = vcmask 195584   ;;  %vm989_vm13 = vcmask 523264  }
  0x36   : > { %v2526_v0 = vld [vmem:[%s429_s26] sm:$0xff]  ;;  %532 = vmatpush.bf16.msra.mxu1 %v1933_v18  ;;  %563 = vmatpush.bf16.msra.mxu2 %v1935_v19  ;;  %s2356_s26 = smov 112   ;;  %v2359_v19 = vmov 1934713408   ;;  %s1573_s18 = sld [smem:[#allocation4]] }
  0x37   : > { %v440_v1 = vsel %vm439_vm0, %v2526_v0, 0.0  ;;  %v2056_v3 = vpop.eup %2055  ;;  %s424_s15 = sand.u32 1, %s2335_s22   ;;  %s2287_s14 = scalar_lea.hbm %s2907_s11, 2 }
  0x38   : > { %441 = vadd.xlane.f32.xlu0 %v440_v1  ;;  %v444_v4 = vmul.f32 32.0, %v2056_v3  ;;  %vm448_vm1 = vweird.f32 %v2056_v3 }
  0x3a   : > { %v445_v5 = vsub.f32 1.0, %v444_v4 }
  0x3c   : > { %v446_v6 = vmul.f32 %v2056_v3, %v445_v5  ;;  %v2589_v5 = vld [vmem:[%s2903_s7] sm:$0xff]  ;;  %s1574_s25 = scalar_lea.vmem [#allocation2], %s1573_s18 }
  0x3e   : > { %v447_v7 = vadd.f32 %v2056_v3, %v446_v6 }
  0x40   : > { %v2530_v8 = vsel %vm448_vm1, %v2056_v3, %v447_v7 }
  0xab   : > { %v442_v9 = vpop.xlane.xlu0 %441 }
  0xac   : > { %v450_v10 = vmul.f32 %v2530_v8, %v442_v9 }
  0xae   : > { %v451_v11 = vsub.f32 %v2526_v0, %v450_v10  ;;  %v2358_v10 = vmov 1983009808  }
  0xb0   : > { %v452_v12 = vmul.f32 %v451_v11, %v451_v11 }
  0xb2   : > { %v453_v13 = vsel %vm439_vm0, %v452_v12, 0.0 }
  0xb3   : > { %454 = vadd.xlane.f32.xlu0 %v453_v13 }
 0x126   : > { %v455_v20 = vpop.xlane.xlu0 %454 }
 0x127   : > { %v456_v21 = vmul.f32 %v455_v20, %v2530_v8  ;;  %v644_v20 = vunpack.c.l.s4 %v2359_v19 }
 0x129   : > { %v457_v22 = vadd.f32 1e-05, %v456_v21 }
 0x12b   : > { %2057 = vrsqrt.f32 %v457_v22  ;;  %vm464_vm3 = vweird.f32 %v457_v22 }
 0x131   : > { %v2058_v23 = vpop.eup %2057 }
 0x132   : > { %v459_v24 = vmul.f32 %v2058_v23, %v457_v22  ;;  %vm465_vm2 = vweird.f32 %v2058_v23 }
 0x133   : > { %vm466_vm4 = vmor %vm464_vm3, %vm465_vm2 }
 0x134   : > { %v460_v25 = vmul.f32 %v2058_v23, %v459_v24 }
 0x136   : > { %v461_v26 = vmul.f32 0.5, %v460_v25 }
 0x138   : > { %v462_v27 = vsub.f32 1.5, %v461_v26 }
 0x13a   : > { %v463_v29 = vmul.f32 %v2058_v23, %v462_v27  ;;  %v2602_v27 = vunpack.c.0.s8 %v644_v20 }
 0x13c   : > { %v467_v31 = vsel %vm466_vm4, %v2058_v23, %v463_v29 }
 0x13d   : > { %v468_v32 = vmul.f32 %v467_v31, %v451_v11  ;;  %v620_v11 = vunpack.c.l.s4 %v2358_v10 }
 0x13f   : > { %v470_v34 = vmul.f32 %v469_v30, %v468_v32  ;;  %v2595_v15 = vunpack.c.0.s8 %v620_v11 }
 0x141   : > { %v472_v35 = vadd.f32 %v471_v33, %v470_v34 }
 0x143   : > { %v473_v36 = vpack.c.bf16 %v472_v35, %v472_v35 }
 0x145   : > { %1770 = vmatmul.msk.bf16.vlgmr.msra.gmra.mxu0 %vm439_vm0, %v473_v36  ;;  %1783 = vmatmul.msk.bf16.vlgmr.msra.gmra.mxu1 %vm439_vm0, %v473_v36 }
 0x146   : > { %1796 = vmatmul.msk.bf16.vlgmr.msra.gmra.mxu2 %vm439_vm0, %v473_v36 }
 0x1c2   : > { %v503_v38 = vpop.f32.mrf.mxu0  ;;  %v534_v39 = vpop.f32.mrf.mxu1 }
 0x1c3   : > { %v535_v42 = vadd.f32 %v534_v39, %v512_v37  ;;  %v504_v3 = vadd.f32 %v503_v38, %v478_v62 }
 0x1c5   : > { %v571_v43 = vmul.f32 %v535_v42, %v2565_v40  ;;  %v572_v44 = vmul.f32 %v535_v42, %v2567_v41  ;;  %v569_v51 = vmul.f32 %v535_v42, %v2572_v46  ;;  %v570_v52 = vmul.f32 %v535_v42, %v2574_v47 }
 0x1c6   : > { %v581_v4 = vpack.c.bf16 %v504_v3, %v504_v3 }
 0x1c7   : > { %v574_v48 = vpack.c.bf16 %v572_v44, %v571_v43  ;;  %v573_v58 = vpack.c.bf16 %v570_v52, %v569_v51 }
 0x1c9   : > { %v565_v49 = vpop.f32.mrf.mxu2  ;;  %v589_v50 = vsel %vm439_vm0, %v574_v48, 0  ;;  %v586_v1 = vsel %vm439_vm0, %v573_v58, 0 }
 0x1ca   : > { %v566_v53 = vadd.f32 %v565_v49, %v543_v45  ;;  %v505_v54 = vpop.f32.mrf.mxu0  ;;  %v536_v55 = vpop.f32.mrf.mxu1  ;;  %597 = vmatpush.bf16.xpose.msra.mxu3 %v589_v50 }
 0x1cc   : > { %v577_v56 = vmul.f32 %v566_v53, %v2565_v40  ;;  %v578_v57 = vmul.f32 %v566_v53, %v2567_v41  ;;  %v575_v60 = vmul.f32 %v566_v53, %v2572_v46  ;;  %v576_v61 = vmul.f32 %v566_v53, %v2574_v47 }
 0x1ce   : > { %v580_v59 = vpack.c.bf16 %v578_v57, %v577_v56  ;;  %v579_v2 = vpack.c.bf16 %v576_v61, %v575_v60 }
 0x1d0   : > { %844 = vmatpush.bf16.msrb.mxu0 %v580_v59 }
 0x1d1   : > { %v567_v63 = vpop.f32.mrf.mxu2 }
 0x1d2   : > { %598 = vmatpush.bf16.xpose.msra.mxu3 %v586_v1 }
 0x1d4   : > { %845 = vmatpush.bf16.msrb.mxu0 %v579_v2 }
 0x1d9   : > { %1797 = vmatmul.msk.bf16.vlgmr.msra.gmra.mxu3 %vm439_vm0, %v581_v4 }
 0x25c   : > { %v600_v6 = vpop.f32.mrf.mxu3 }
 0x25d   : > { %v601_v7 = vadd.f32 %v600_v6, %v2589_v5 }
 0x25f   : > { %605 = vrot.lane.b32.xlu2 %v601_v7, %s2355_s23  ;;  %608 = vrot.lane.b32.xlu1 %v601_v7, %s2356_s26  ;;  %v617_v14 = vrot.slane %v601_v7, 4 }
 0x264   : > { %v602_v9 = vpop.f32.mrf.mxu3 }
 0x267   : > { %611 = vrot.lane.b32.xlu1 %v601_v7, %s2357_s29 }
 0x2b9   : > { %v606_v17 = vpop.permute.xlu2 %605 }
 0x2ba   : > { %v629_v22 = vrot.slane %v606_v17, 4 }
 0x2d1   : > { %v609_v12 = vpop.permute.xlu1 %608 }
 0x2d2   : > { %v614_v13 = vrot.slane %v609_v12, 4  ;;  %v618_v16 = vsel %vm615_vm5, %v609_v12, %v617_v14 }
 0x2d3   : > { %v626_v21 = vperm.slane %v618_v16, %v2595_v15 }
 0x2d4   : > { %v616_v18 = vsel %vm615_vm5, %v614_v13, %v601_v7 }
 0x2d5   : > { %v622_v23 = vperm.slane %v616_v18, %v2595_v15  ;;  %v653_v29 = vrot.slane %v626_v21, 4 }
 0x2d7   : > { %v641_v32 = vrot.slane %v622_v23, 4 }
 0x2d9   : > { %v612_v24 = vpop.permute.xlu1 %611 }
 0x2da   : > { %v627_v25 = vrot.slane %v612_v24, 4  ;;  %v630_v26 = vsel %vm615_vm5, %v612_v24, %v629_v22 }
 0x2db   : > { %v638_v30 = vperm.slane %v630_v26, %v2595_v15 }
 0x2dc   : > { %v628_v31 = vsel %vm615_vm5, %v627_v25, %v606_v17 }
 0x2dd   : > { %v634_v33 = vperm.slane %v628_v31, %v2595_v15  ;;  %v651_v34 = vrot.slane %v638_v30, 4  ;;  %v654_v35 = vsel %vm615_vm5, %v638_v30, %v653_v29 }
 0x2de   : > { %v662_v36 = vperm.slane %v654_v35, %v2602_v27 }
 0x2df   : > { %v639_v37 = vrot.slane %v634_v33, 4  ;;  %v642_v38 = vsel %vm615_vm5, %v634_v33, %v641_v32  ;;  %v652_v39 = vsel %vm615_vm5, %v651_v34, %v626_v21 }
 0x2e0   : > { %v690_v42 = vsel %vm671_vm6, %v662_v36, -inf  ;;  %v650_v43 = vperm.slane %v642_v38, %v2602_v27  ;;  %v658_v49 = vperm.slane %v652_v39, %v2602_v27  ;;  %v669_v57 = vrot.slane %v662_v36, 4 }
 0x2e1   : > { %691 = vmax.xlane.f32.xlu0 %v690_v42  ;;  %v640_v44 = vsel %vm615_vm5, %v639_v37, %v622_v23 }
 0x2e2   : > { %v665_v45 = vrot.slane %v650_v43, 4  ;;  %v2615_v48 = vperm.slane %v640_v44, %v2602_v27  ;;  %v667_v54 = vrot.slane %v658_v49, 4  ;;  %v678_v56 = vsel %vm671_vm6, %v650_v43, -inf }
 0x2e3   : > { %v670_v60 = vsel %vm615_vm5, 0.0, %v669_v57  ;;  %v684_v62 = vsel %vm671_vm6, %v658_v49, -inf }
 0x2e4   : > { %v666_v50 = vsel %vm615_vm5, 0.0, %v665_v45  ;;  %v663_v51 = vrot.slane %v2615_v48, 4  ;;  %v668_v58 = vsel %vm615_vm5, 0.0, %v667_v54  ;;  %v693_v61 = vsel %vm671_vm6, %v670_v60, -inf }
 0x2e5   : > { %v681_v52 = vsel %vm671_vm6, %v666_v50, -inf  ;;  %v687_v59 = vsel %vm671_vm6, %v668_v58, -inf  ;;  %v672_v63 = vsel %vm671_vm6, %v2615_v48, -inf }
 0x2e6   : > { %682 = vmax.xlane.f32.xlu2 %v681_v52  ;;  %v664_v53 = vsel %vm615_vm5, 0.0, %v663_v51 }
 0x2e7   : > { %v675_v55 = vsel %vm671_vm6, %v664_v53, -inf }
 0x2e8   : > { %676 = vmax.xlane.f32.xlu1 %v675_v55 }
 0x2e9   : > { %679 = vmax.xlane.f32.xlu0 %v678_v56 }
 0x2ee   : > { %688 = vmax.xlane.f32.xlu2 %v687_v59 }
 0x2f1   : > { %694 = vmax.xlane.f32.xlu0 %v693_v61 }
 0x2f9   : > { %685 = vmax.xlane.f32.xlu0 %v684_v62 }
 0x301   : > { %673 = vmax.xlane.f32.xlu0 %v672_v63 }
 0x354   : > { %v692_v1 = vpop.xlane.xlu0 %691 }
 0x355   : > { %v702_v2 = vsub.f32 %v662_v36, %v692_v1 }
 0x357   : > { %v716_v3 = vmul.f32 1.442695, %v702_v2 }
 0x359   : > { %2059 = vpow2.f32 %v716_v3  ;;  %v683_v4 = vpop.xlane.xlu2 %682 }
 0x35a   : > { %v699_v13 = vsub.f32 %v666_v50, %v683_v4 }
 0x35b   : > { %v677_v6 = vpop.xlane.xlu1 %676 }
 0x35c   : > { %v697_v7 = vsub.f32 %v664_v53, %v677_v6  ;;  %v680_v9 = vpop.xlane.xlu0 %679  ;;  %v710_v17 = vmul.f32 1.442695, %v699_v13 }
 0x35d   : > { %v698_v10 = vsub.f32 %v650_v43, %v680_v9 }
 0x35e   : > { %v706_v11 = vmul.f32 1.442695, %v697_v7 }
 0x35f   : > { %v2631_v12 = vpop.eup %2059  ;;  %v708_v14 = vmul.f32 1.442695, %v698_v10 }
 0x360   : > { %2061 = vpow2.f32 %v706_v11  ;;  %v738_v16 = vsel %vm671_vm6, %v2631_v12, 0.0 }
 0x361   : > { %2063 = vpow2.f32 %v708_v14  ;;  %739 = vadd.xlane.f32.xlu2 %v738_v16  ;;  %v689_v18 = vpop.xlane.xlu2 %688 }
 0x362   : > { %2065 = vpow2.f32 %v710_v17  ;;  %v701_v23 = vsub.f32 %v668_v58, %v689_v18 }
 0x364   : > { %v695_v19 = vpop.xlane.xlu0 %694  ;;  %v714_v29 = vmul.f32 1.442695, %v701_v23 }
 0x365   : > { %v703_v20 = vsub.f32 %v670_v60, %v695_v19 }
 0x366   : > { %v2635_v21 = vpop.eup %2061 }
 0x367   : > { %v2637_v22 = vpop.eup %2063  ;;  %v718_v24 = vmul.f32 1.442695, %v703_v20  ;;  %v723_v25 = vsel %vm671_vm6, %v2635_v21, 0.0 }
 0x368   : > { %724 = vadd.xlane.f32.xlu1 %v723_v25  ;;  %v726_v26 = vsel %vm671_vm6, %v2637_v22, 0.0  ;;  %v2066_v31 = vpop.eup %2065 }
 0x369   : > { %2067 = vpow2.f32 %v718_v24  ;;  %727 = vadd.xlane.f32.xlu0 %v726_v26  ;;  %v729_v35 = vsel %vm671_vm6, %v2066_v31, 0.0 }
 0x36a   : > { %2069 = vpow2.f32 %v714_v29 }
 0x36c   : > { %v686_v30 = vpop.xlane.xlu0 %685 }
 0x36d   : > { %v700_v32 = vsub.f32 %v658_v49, %v686_v30 }
 0x36f   : > { %v2068_v33 = vpop.eup %2067  ;;  %v712_v34 = vmul.f32 1.442695, %v700_v32 }
 0x370   : > { %v741_v36 = vsel %vm671_vm6, %v2068_v33, 0.0  ;;  %v2070_v38 = vpop.eup %2069 }
 0x371   : > { %2071 = vpow2.f32 %v712_v34  ;;  %730 = vadd.xlane.f32.xlu0 %v729_v35  ;;  %742 = vadd.xlane.f32.xlu2 %v741_v36  ;;  %v735_v45 = vsel %vm671_vm6, %v2070_v38, 0.0 }
 0x374   : > { %v674_v37 = vpop.xlane.xlu0 %673 }
 0x375   : > { %v696_v39 = vsub.f32 %v2615_v48, %v674_v37 }
 0x377   : > { %v2072_v42 = vpop.eup %2071  ;;  %v704_v43 = vmul.f32 1.442695, %v696_v39 }
 0x378   : > { %v732_v44 = vsel %vm671_vm6, %v2072_v42, 0.0 }
 0x379   : > { %2073 = vpow2.f32 %v704_v43  ;;  %733 = vadd.xlane.f32.xlu1 %v732_v44  ;;  %736 = vadd.xlane.f32.xlu2 %v735_v45 }
 0x37f   : > { %v2074_v49 = vpop.eup %2073 }
 0x380   : > { %v720_v50 = vsel %vm671_vm6, %v2074_v49, 0.0 }
 0x381   : > { %721 = vadd.xlane.f32.xlu0 %v720_v50 }
 0x3d4   : > { %v740_v51 = vpop.xlane.xlu2 %739 }
 0x3d5   : > { %2075 = vrcp.f32 %v740_v51 }
 0x3db   : > { %v725_v53 = vpop.xlane.xlu1 %724  ;;  %v2076_v48 = vpop.eup %2075 }
 0x3dc   : > { %v728_v52 = vpop.xlane.xlu0 %727  ;;  %v758_v60 = vmul.f32 %v2076_v48, %v2631_v12 }
 0x3de   : > { %v772_v3 = vrot.slane %v758_v60, 4 }
 0x3e4   : > { %v731_v54 = vpop.xlane.xlu0 %730  ;;  %v743_v55 = vpop.xlane.xlu2 %742 }
 0x3e5   : > { %2077 = vrcp.f32 %v731_v54  ;;  %v1937_v54 = vld [vmem:[#allocation5] sm:$0xff] }
 0x3e6   : > { %2079 = vrcp.f32 %v743_v55 }
 0x3e7   : > { %2081 = vrcp.f32 %v725_v53  ;;  %v1938_v53 = vld [vmem:[#allocation5 + $0x8] sm:$0xff] }
 0x3e8   : > { %877 = vmatpush.bf16.msrb.mxu1 %v1938_v53 }
 0x3eb   : > { %v2078_v58 = vpop.eup %2077 }
 0x3ec   : > { %v734_v56 = vpop.xlane.xlu1 %733  ;;  %v737_v57 = vpop.xlane.xlu2 %736  ;;  %v755_v61 = vmul.f32 %v2078_v58, %v2066_v31  ;;  %878 = vmatpush.bf16.msrb.mxu1 %v1937_v54 }
 0x3ed   : > { %2083 = vrcp.f32 %v734_v56  ;;  %v2080_v59 = vpop.eup %2079 }
 0x3ee   : > { %2085 = vrcp.f32 %v737_v57  ;;  %v759_v62 = vmul.f32 %v2080_v59, %v2068_v33  ;;  %v2082_v63 = vpop.eup %2081  ;;  %v766_v4 = vrot.slane %v755_v61, 4 }
 0x3ef   : > { %2087 = vrcp.f32 %v728_v52  ;;  %v753_v13 = vmul.f32 %v2082_v63, %v2635_v21 }
 0x3f0   : > { %v778_v10 = vrot.slane %v759_v62, 4 }
 0x3f1   : > { %v767_v18 = vsel %vm615_vm5, %v766_v4, %v753_v13 }
 0x3f2   : > { %v771_v25 = vperm.slane %v767_v18, %v2595_v15 }
 0x3f3   : > { %v2084_v1 = vpop.eup %2083 }
 0x3f4   : > { %v2086_v2 = vpop.eup %2085  ;;  %v756_v6 = vmul.f32 %v2084_v1, %v2072_v42  ;;  %v722_v7 = vpop.xlane.xlu0 %721  ;;  %v784_v33 = vrot.slane %v771_v25, 4  ;;  %v885_v1 = vperm.slane %v2557_v28, 3 }
 0x3f5   : > { %v2088_v9 = vpop.eup %2087  ;;  %v757_v11 = vmul.f32 %v2086_v2, %v2070_v38  ;;  %2089 = vrcp.f32 %v722_v7 }
 0x3f6   : > { %v773_v14 = vsel %vm615_vm5, %v772_v3, %v756_v6  ;;  %v754_v17 = vmul.f32 %v2088_v9, %v2637_v22 }
 0x3f7   : > { %v777_v16 = vperm.slane %v773_v14, %v2595_v15  ;;  %v779_v12 = vsel %vm615_vm5, %v778_v10, %v757_v11 }
 0x3f8   : > { %v783_v19 = vperm.slane %v779_v12, %v2595_v15  ;;  %v760_v26 = vrot.slane %v754_v17, 4  ;;  %v1939_v12 = vld [vmem:[#allocation8] sm:$0xff] }
 0x3f9   : > { %v798_v20 = vrot.slane %v777_v16, 4 }
 0x3fa   : > { %v796_v23 = vrot.slane %v783_v19, 4 }
 0x3fb   : > { %v2090_v24 = vpop.eup %2089  ;;  %v799_v30 = vsel %vm615_vm5, %v783_v19, %v798_v20 }
 0x3fc   : > { %v752_v29 = vmul.f32 %v2090_v24, %v2074_v49  ;;  %v797_v21 = vsel %vm615_vm5, %v796_v23, %v777_v16  ;;  %v807_v34 = vperm.slane %v799_v30, %v2602_v27  ;;  %v1940_v16 = vld [vmem:[#allocation8 + $0x8] sm:$0xff] }
 0x3fd   : > { %v803_v32 = vperm.slane %v797_v21, %v2602_v27  ;;  %940 = vmatpush.bf16.msrb.mxu2 %v1940_v16 }
 0x3fe   : > { %v761_v31 = vsel %vm615_vm5, %v760_v26, %v752_v29  ;;  %v812_v43 = vrot.slane %v807_v34, 4  ;;  %v438_v26 = vld [vmem:[%s2902_s6 + $0x8] sm:$0x3] }
 0x3ff   : > { %v765_v22 = vperm.slane %v761_v31, %v2595_v15  ;;  %v808_v38 = vrot.slane %v803_v32, 4  ;;  %v909_v21 = vperm.slane %v438_v26, 0 }
 0x401   : > { %v786_v35 = vrot.slane %v765_v22, 4  ;;  %v785_v36 = vsel %vm615_vm5, %v784_v33, %v765_v22  ;;  %941 = vmatpush.bf16.msrb.mxu2 %v1939_v12 }
 0x402   : > { %v791_v37 = vperm.slane %v785_v36, %v2602_v27  ;;  %v1943_v36 = vld [vmem:[%s2901_s5 + $0x10] sm:$0xff] }
 0x403   : > { %v787_v39 = vsel %vm615_vm5, %v771_v25, %v786_v35  ;;  %v1944_v35 = vld [vmem:[%s2901_s5 + $0x18] sm:$0xff] }
 0x404   : > { %v795_v42 = vperm.slane %v787_v39, %v2602_v27  ;;  %v810_v44 = vrot.slane %v791_v37, 4  ;;  %v809_v45 = vsel %vm615_vm5, %v808_v38, %v791_v37  ;;  %997 = vmatpush.bf16.msrb.mxu3 %v1944_v35  ;;  %v1942_v37 = vld [vmem:[%s2901_s5 + $0x8] sm:$0xff]  ;;  %v1941_v38 = vld [vmem:[%s2901_s5] sm:$0xff]  ;;  %v918_v39 = vperm.slane %v2557_v28, 4 }
 0x406   : > { %v813_v49 = vsel %vm615_vm5, %v812_v43, %v795_v42  ;;  %v811_v50 = vsel %vm615_vm5, %v803_v32, %v810_v44  ;;  %v814_v51 = vrot.slane %v795_v42, 4  ;;  %v911_v32 = vperm.slane %v438_v26, 1 }
 0x407   : > { %821 = vrot.lane.b32.xlu0 %v813_v49, %s2360_s12  ;;  %817 = vrot.lane.b32.xlu1 %v811_v50, %s2361_s13 }
 0x408   : > { %v815_v52 = vsel %vm615_vm5, %v807_v34, %v814_v51  ;;  %998 = vmatpush.bf16.msrb.mxu3 %v1943_v36 }
 0x409   : > { %825 = vrot.lane.b32.xlu2 %v815_v52, %s2362_s19 }
 0x40c   : > { %999 = vmatpush.bf16.msrb.mxu3 %v1942_v37 }
 0x410   : > { %1000 = vmatpush.bf16.msrb.mxu3 %v1941_v38 }
 0x463   : > { %v826_v57 = vpop.permute.xlu2 %825 }
 0x479   : > { %v822_v55 = vpop.permute.xlu0 %821  ;;  %v818_v48 = vpop.permute.xlu1 %817 }
 0x47a   : > { %v829_v56 = vsel %vm828_vm7, %v809_v45, %v818_v48 }
 0x47b   : > { %v831_v58 = vsel %vm830_vm8, %v829_v56, %v822_v55 }
 0x47c   : > { %v833_v59 = vsel %vm832_vm9, %v831_v58, %v826_v57  ;;  %v1007_v57 = vperm.slane %v2557_v28, 5  ;;  %v1948_v28 = vld [vmem:[%s2898_s2 + $0x48] sm:$0xff] }
 0x47d   : > { %v834_v60 = vpack.c.bf16 %v833_v59, %v833_v59  ;;  %1097 = vmatpush.bf16.msra.mxu1 %v1948_v28 }
 0x47f   : > { %1798 = vmatmul.msk.bf16.vlgmr.msrb.gmra.mxu0 %vm439_vm0, %v834_v60 }
 0x4fc   : > { %v847_v61 = vpop.f32.mrf.mxu0 }
 0x4fd   : > { %v855_v62 = vpack.c.bf16 %v847_v61, %v847_v61 }
 0x4ff   : > { %1807 = vmatmul.msk.bf16.vlgmr.msrb.gmra.mxu1 %vm439_vm0, %v855_v62 }
 0x504   : > { %v849_v63 = vpop.f32.mrf.mxu0 }
 0x57c   : > { %v880_v2 = vpop.f32.mrf.mxu1 }
 0x57d   : > { %v884_v3 = vadd.f32 %v880_v2, %v2526_v0 }
 0x57f   : > { %v2682_v4 = vadd.f32 %v885_v1, %v884_v3 }
 0x581   : > { %v887_v6 = vsel %vm439_vm0, %v2682_v4, 0.0 }
 0x582   : > { %888 = vadd.xlane.f32.xlu1 %v887_v6 }
 0x584   : > { %v882_v7 = vpop.f32.mrf.mxu1 }
 0x585   : > { %v1950_v7 = vld [vmem:[%s2898_s2 + $0x58] sm:$0xff] }
 0x586   : > { %1128 = vmatpush.bf16.msra.mxu2 %v1950_v7 }
 0x5f5   : > { %v889_v9 = vpop.xlane.xlu1 %888 }
 0x5f6   : > { %v890_v10 = vmul.f32 %v889_v9, %v2530_v8  ;;  %v1947_v9 = vld [vmem:[%s2898_s2 + $0x40] sm:$0xff] }
 0x5f7   : > { %1098 = vmatpush.bf16.msra.mxu1 %v1947_v9 }
 0x5f8   : > { %v891_v11 = vsub.f32 %v2682_v4, %v890_v10  ;;  %v1945_v10 = vld [vmem:[%s2898_s2 + $0x30] sm:$0xff] }
 0x5fa   : > { %v892_v13 = vmul.f32 %v891_v11, %v891_v11 }
 0x5fc   : > { %v893_v14 = vsel %vm439_vm0, %v892_v13, 0.0 }
 0x5fd   : > { %894 = vadd.xlane.f32.xlu0 %v893_v14 }
 0x670   : > { %v895_v0 = vpop.xlane.xlu0 %894 }
 0x671   : > { %v896_v17 = vmul.f32 %v895_v0, %v2530_v8 }
 0x673   : > { %v897_v18 = vadd.f32 1e-05, %v896_v17 }
 0x675   : > { %2091 = vrsqrt.f32 %v897_v18  ;;  %vm904_vm11 = vweird.f32 %v897_v18 }
 0x67b   : > { %v2092_v19 = vpop.eup %2091 }
 0x67c   : > { %v899_v20 = vmul.f32 %v2092_v19, %v897_v18  ;;  %vm905_vm10 = vweird.f32 %v2092_v19 }
 0x67d   : > { %vm906_vm12 = vmor %vm904_vm11, %vm905_vm10 }
 0x67e   : > { %v900_v23 = vmul.f32 %v2092_v19, %v899_v20 }
 0x680   : > { %v901_v24 = vmul.f32 0.5, %v900_v23 }
 0x682   : > { %v902_v25 = vsub.f32 1.5, %v901_v24 }
 0x684   : > { %v903_v29 = vmul.f32 %v2092_v19, %v902_v25 }
 0x686   : > { %v907_v30 = vsel %vm906_vm12, %v2092_v19, %v903_v29  ;;  %v2739_v19 = vld [vmem:[%s2902_s6 + $0x10] sm:$0xff] }
 0x687   : > { %v908_v31 = vmul.f32 %v907_v30, %v891_v11  ;;  %v1949_v11 = vld [vmem:[%s2898_s2 + $0x50] sm:$0xff]  ;;  %v1034_v24 = vperm.slane %v2739_v19, 6  ;;  %v1036_v29 = vperm.slane %v2739_v19, 7  ;;  %v1109_v37 = vperm.slane %v2739_v19, 2 }
 0x688   : > { %1129 = vmatpush.bf16.msra.mxu2 %v1949_v11 }
 0x689   : > { %v910_v22 = vmul.f32 %v909_v21, %v908_v31 }
 0x68b   : > { %v912_v33 = vadd.f32 %v911_v32, %v910_v22  ;;  %v1078_v32 = vperm.slane %v2739_v19, 1 }
 0x68d   : > { %v917_v34 = vpack.c.bf16 %v912_v33, %v912_v33 }
 0x68f   : > { %1816 = vmatmul.msk.bf16.vlgmr.msrb.gmra.mxu2 %vm439_vm0, %v917_v34 }
 0x712   : > { %v943_v42 = vpop.f32.mrf.mxu2 }
 0x713   : > { %v944_v43 = vadd.f32 %v943_v42, %v918_v39 }
 0x715   : > { %v947_v44 = vmul.f32 %v944_v43, %v944_v43 }
 0x717   : > { %v948_v45 = vmul.f32 %v947_v44, %v944_v43 }
 0x719   : > { %v949_v49 = vmul.f32 0.044715, %v948_v45 }
 0x71a   : > { %v945_v50 = vpop.f32.mrf.mxu2 }
 0x71b   : > { %v950_v51 = vadd.f32 %v949_v49, %v944_v43 }
 0x71d   : > { %v951_v52 = vmul.f32 0.7978846, %v950_v51 }
 0x71f   : > { %2093 = vtanh.f32 %v951_v52 }
 0x725   : > { %v2094_v53 = vpop.eup %2093 }
 0x726   : > { %v953_v54 = vadd.f32 1.0, %v2094_v53 }
 0x728   : > { %v954_v55 = vmul.f32 0.5, %v953_v54 }
 0x72a   : > { %v955_v48 = vmul.f32 %v954_v55, %v944_v43 }
 0x72c   : > { %v964_v56 = vpack.c.bf16 %v955_v48, %v955_v48 }
 0x72e   : > { %1833 = vmatmul.msk.bf16.vlgmr.msrb.gmra.mxu3 %vm989_vm13, %v964_v56  ;;  %v1044_v56 = vperm.slane %v2739_v19, 0 }
 0x7b1   : > { %v1002_v58 = vpop.f32.mrf.mxu3 }
 0x7b2   : > { %v1006_v59 = vadd.f32 %v1002_v58, %v2682_v4  ;;  %v1946_v4 = vld [vmem:[%s2898_s2 + $0x38] sm:$0xff] }
 0x7b3   : > { %1066 = vmatpush.bf16.msra.mxu0 %v1946_v4 }
 0x7b4   : > { %v2710_v60 = vadd.f32 %v1007_v57, %v1006_v59 }
 0x7b6   : > { %v1012_v61 = vsel %vm439_vm0, %v2710_v60, 0.0 }
 0x7b7   : > { %1013 = vadd.xlane.f32.xlu2 %v1012_v61  ;;  %1067 = vmatpush.bf16.msra.mxu0 %v1945_v10 }
 0x7b9   : > { %v1004_v62 = vpop.f32.mrf.mxu3 }
 0x82a   : > { %v1014_v63 = vpop.xlane.xlu2 %1013 }
 0x82b   : > { %v1015_v1 = vmul.f32 %v1014_v63, %v2530_v8 }
 0x82d   : > { %v1016_v2 = vsub.f32 %v2710_v60, %v1015_v1 }
 0x82f   : > { %v1017_v3 = vmul.f32 %v1016_v2, %v1016_v2 }
 0x831   : > { %v1018_v6 = vsel %vm439_vm0, %v1017_v3, 0.0 }
 0x832   : > { %1019 = vadd.xlane.f32.xlu1 %v1018_v6 }
 0x8a5   : > { %v1020_v13 = vpop.xlane.xlu1 %1019 }
 0x8a6   : > { %v1021_v14 = vmul.f32 %v1020_v13, %v2530_v8 }
 0x8a8   : > { %v1022_v16 = vadd.f32 1e-05, %v1021_v14 }
 0x8aa   : > { %2095 = vrsqrt.f32 %v1022_v16  ;;  %vm1029_vm15 = vweird.f32 %v1022_v16 }
 0x8b0   : > { %v2096_v12 = vpop.eup %2095 }
 0x8b1   : > { %v1024_v0 = vmul.f32 %v2096_v12, %v1022_v16  ;;  %vm1030_vm14 = vweird.f32 %v2096_v12 }
 0x8b2   : > { %vm1031_vm1 = vmor %vm1029_vm15, %vm1030_vm14 }
 0x8b3   : > { %v1025_v17 = vmul.f32 %v2096_v12, %v1024_v0 }
 0x8b5   : > { %v1026_v18 = vmul.f32 0.5, %v1025_v17 }
 0x8b7   : > { %v1027_v20 = vsub.f32 1.5, %v1026_v18 }
 0x8b9   : > { %v1028_v23 = vmul.f32 %v2096_v12, %v1027_v20 }
 0x8bb   : > { %v1032_v25 = vsel %vm1031_vm1, %v2096_v12, %v1028_v23 }
 0x8bc   : > { %v1033_v26 = vmul.f32 %v1032_v25, %v1016_v2 }
 0x8be   : > { %v1035_v21 = vmul.f32 %v1034_v24, %v1033_v26 }
 0x8c0   : > { %v1037_v30 = vadd.f32 %v1036_v29, %v1035_v21 }
 0x8c2   : > { %v1038_v31 = vpack.c.bf16 %v1037_v30, %v1037_v30 }
 0x8c4   : > { %1848 = vmatmul.msk.bf16.vlgmr.msra.gmra.mxu0 %vm439_vm0, %v1038_v31  ;;  %1861 = vmatmul.msk.bf16.vlgmr.msra.gmra.mxu1 %vm439_vm0, %v1038_v31 }
 0x8c5   : > { %1874 = vmatmul.msk.bf16.vlgmr.msra.gmra.mxu2 %vm439_vm0, %v1038_v31 }
 0x941   : > { %v1069_v22 = vpop.f32.mrf.mxu0  ;;  %v1100_v33 = vpop.f32.mrf.mxu1 }
 0x942   : > { %v1101_v34 = vadd.f32 %v1100_v33, %v1078_v32  ;;  %v1070_v61 = vadd.f32 %v1069_v22, %v1044_v56 }
 0x944   : > { %v1137_v35 = vmul.f32 %v1101_v34, %v2565_v40  ;;  %v1138_v36 = vmul.f32 %v1101_v34, %v2567_v41  ;;  %v1135_v43 = vmul.f32 %v1101_v34, %v2572_v46  ;;  %v1136_v44 = vmul.f32 %v1101_v34, %v2574_v47 }
 0x945   : > { %v1147_v62 = vpack.c.bf16 %v1070_v61, %v1070_v61 }
 0x946   : > { %v1140_v38 = vpack.c.bf16 %v1138_v36, %v1137_v35  ;;  %v1139_v53 = vpack.c.bf16 %v1136_v44, %v1135_v43 }
 0x948   : > { %v1131_v39 = vpop.f32.mrf.mxu2  ;;  %v1155_v42 = vsel %vm439_vm0, %v1140_v38, 0  ;;  %v1152_v58 = vsel %vm439_vm0, %v1139_v53, 0 }
 0x949   : > { %v1132_v45 = vadd.f32 %v1131_v39, %v1109_v37  ;;  %v1071_v49 = vpop.f32.mrf.mxu0  ;;  %v1102_v50 = vpop.f32.mrf.mxu1  ;;  %1163 = vmatpush.bf16.xpose.msra.mxu3 %v1155_v42 }
 0x94b   : > { %v1143_v51 = vmul.f32 %v1132_v45, %v2565_v40  ;;  %v1144_v52 = vmul.f32 %v1132_v45, %v2567_v41  ;;  %v1141_v55 = vmul.f32 %v1132_v45, %v2572_v46  ;;  %v1142_v48 = vmul.f32 %v1132_v45, %v2574_v47 }
 0x94d   : > { %v1146_v54 = vpack.c.bf16 %v1144_v52, %v1143_v51  ;;  %v1145_v59 = vpack.c.bf16 %v1142_v48, %v1141_v55 }
 0x94f   : > { %1405 = vmatpush.bf16.msrb.mxu0 %v1146_v54 }
 0x950   : > { %v1133_v57 = vpop.f32.mrf.mxu2 }
 0x951   : > { %1164 = vmatpush.bf16.xpose.msra.mxu3 %v1152_v58 }
 0x953   : > { %1406 = vmatpush.bf16.msrb.mxu0 %v1145_v59 }
 0x958   : > { %1875 = vmatmul.msk.bf16.vlgmr.msra.gmra.mxu3 %vm439_vm0, %v1147_v62 }
 0x9db   : > { %v1166_v40 = vpop.f32.mrf.mxu3 }
 0x9dc   : > { %v1167_v41 = vadd.f32 %v1166_v40, %v2589_v5 }
 0x9de   : > { %1171 = vrot.lane.b32.xlu1 %v1167_v41, %s2355_s23  ;;  %1177 = vrot.lane.b32.xlu2 %v1167_v41, %s2357_s29  ;;  %v1182_v2 = vrot.slane %v1167_v41, 4  ;;  %s425_s23 = scalar_lea.vmem [#allocation13], %s424_s15  ;;  %s1652_s29 = sshll.u32 %s1648_s21, 4  ;;  %s1653_s29 = int_to_ptr.hbm [resolvable:$true] %s1652_s29 }
 0x9df   : > { %1174 = vrot.lane.b32.xlu0 %v1167_v41, %s2356_s26  ;;  %s1650_s26 = sshll.u32 %s425_s23, 4  ;;  %s1651_s26 = int_to_ptr.vmem [resolvable:$true] %s1650_s26 }
 0x9e3   : > { %v1168_v46 = vpop.f32.mrf.mxu3 }
 0xa38   : > { %v1178_v47 = vpop.permute.xlu2 %1177 }
 0xa39   : > { %v1192_v63 = vrot.slane %v1178_v47, 4 }
 0xa50   : > { %v1172_v1 = vpop.permute.xlu1 %1171 }
 0xa51   : > { %v1193_v3 = vsel %vm615_vm5, %v1192_v63, %v1172_v1  ;;  %v1194_v6 = vrot.slane %v1172_v1, 4  ;;  %v1175_v28 = vpop.permute.xlu0 %1174 }
 0xa52   : > { %v1199_v4 = vperm.slane %v1193_v3, %v2595_v15  ;;  %v1180_v7 = vrot.slane %v1175_v28, 4  ;;  %v1183_v5 = vsel %vm615_vm5, %v1175_v28, %v1182_v2 }
 0xa53   : > { %v1195_v9 = vsel %vm615_vm5, %v1178_v47, %v1194_v6  ;;  %v1191_v10 = vperm.slane %v1183_v5, %v2595_v15 }
 0xa54   : > { %v1203_v11 = vperm.slane %v1195_v9, %v2595_v15  ;;  %v1204_v13 = vrot.slane %v1199_v4, 4  ;;  %v1181_v14 = vsel %vm615_vm5, %v1180_v7, %v1167_v41 }
 0xa55   : > { %v1187_v16 = vperm.slane %v1181_v14, %v2595_v15  ;;  %v1218_v12 = vrot.slane %v1191_v10, 4 }
 0xa56   : > { %v1216_v20 = vrot.slane %v1203_v11, 4 }
 0xa57   : > { %v1206_v0 = vrot.slane %v1187_v16, 4  ;;  %v1219_v17 = vsel %vm615_vm5, %v1203_v11, %v1218_v12  ;;  %v1205_v18 = vsel %vm615_vm5, %v1204_v13, %v1187_v16 }
 0xa58   : > { %v1227_v23 = vperm.slane %v1219_v17, %v2602_v27  ;;  %v1211_v24 = vperm.slane %v1205_v18, %v2602_v27  ;;  %v1217_v31 = vsel %vm615_vm5, %v1216_v20, %v1191_v10 }
 0xa59   : > { %v1207_v25 = vsel %vm615_vm5, %v1199_v4, %v1206_v0  ;;  %v1223_v36 = vperm.slane %v1217_v31, %v2602_v27 }
 0xa5a   : > { %v1254_v26 = vsel %vm671_vm6, %v1227_v23, -inf  ;;  %v1215_v29 = vperm.slane %v1207_v25, %v2602_v27  ;;  %v1228_v21 = vrot.slane %v1211_v24, 4  ;;  %v1234_v30 = vrot.slane %v1227_v23, 4 }
 0xa5b   : > { %1255 = vmax.xlane.f32.xlu2 %v1254_v26  ;;  %v1232_v39 = vrot.slane %v1223_v36, 4  ;;  %v1236_v43 = vsel %vm671_vm6, %v1211_v24, -inf  ;;  %v1248_v49 = vsel %vm671_vm6, %v1223_v36, -inf }
 0xa5c   : > { %v1242_v32 = vsel %vm671_vm6, %v1215_v29, -inf  ;;  %v1229_v22 = vsel %vm615_vm5, 0.0, %v1228_v21  ;;  %v1230_v34 = vrot.slane %v1215_v29, 4  ;;  %v1235_v35 = vsel %vm615_vm5, 0.0, %v1234_v30 }
 0xa5d   : > { %1243 = vmax.xlane.f32.xlu0 %v1242_v32  ;;  %v1239_v33 = vsel %vm671_vm6, %v1229_v22, -inf  ;;  %v1257_v38 = vsel %vm671_vm6, %v1235_v35, -inf  ;;  %v1233_v44 = vsel %vm615_vm5, 0.0, %v1232_v39 }
 0xa5e   : > { %1240 = vmax.xlane.f32.xlu1 %v1239_v33  ;;  %v1231_v37 = vsel %vm615_vm5, 0.0, %v1230_v34  ;;  %v1251_v45 = vsel %vm671_vm6, %v1233_v44, -inf }
 0xa5f   : > { %v1245_v42 = vsel %vm671_vm6, %v1231_v37, -inf }
 0xa63   : > { %1258 = vmax.xlane.f32.xlu2 %v1257_v38 }
 0xa65   : > { %1246 = vmax.xlane.f32.xlu0 %v1245_v42 }
 0xa66   : > { %1237 = vmax.xlane.f32.xlu1 %v1236_v43 }
 0xa6b   : > { %1252 = vmax.xlane.f32.xlu2 %v1251_v45 }
 0xa6d   : > { %1249 = vmax.xlane.f32.xlu0 %v1248_v49 }
 0xace   : > { %v1256_v50 = vpop.xlane.xlu2 %1255 }
 0xacf   : > { %v1266_v51 = vsub.f32 %v1227_v23, %v1256_v50 }
 0xad0   : > { %v1244_v52 = vpop.xlane.xlu0 %1243 }
 0xad1   : > { %v1280_v53 = vmul.f32 1.442695, %v1266_v51  ;;  %v1262_v54 = vsub.f32 %v1215_v29, %v1244_v52  ;;  %v1241_v55 = vpop.xlane.xlu1 %1240 }
 0xad2   : > { %v1261_v48 = vsub.f32 %v1229_v22, %v1241_v55 }
 0xad3   : > { %2097 = vpow2.f32 %v1280_v53  ;;  %v1272_v56 = vmul.f32 1.442695, %v1262_v54 }
 0xad4   : > { %v1270_v57 = vmul.f32 1.442695, %v1261_v48 }
 0xad5   : > { %2099 = vpow2.f32 %v1272_v56 }
 0xad6   : > { %2101 = vpow2.f32 %v1270_v57  ;;  %v1259_v58 = vpop.xlane.xlu2 %1258 }
 0xad7   : > { %v1267_v59 = vsub.f32 %v1235_v35, %v1259_v58 }
 0xad8   : > { %v1247_v61 = vpop.xlane.xlu0 %1246 }
 0xad9   : > { %v2792_v62 = vpop.eup %2097  ;;  %v1282_v40 = vmul.f32 1.442695, %v1267_v59  ;;  %v1263_v41 = vsub.f32 %v1231_v37, %v1247_v61  ;;  %v1238_v46 = vpop.xlane.xlu1 %1237 }
 0xada   : > { %v1260_v47 = vsub.f32 %v1211_v24, %v1238_v46  ;;  %v1302_v63 = vsel %vm671_vm6, %v2792_v62, 0.0 }
 0xadb   : > { %v2100_v1 = vpop.eup %2099  ;;  %2103 = vpow2.f32 %v1282_v40  ;;  %v1274_v2 = vmul.f32 1.442695, %v1263_v41  ;;  %1303 = vadd.xlane.f32.xlu1 %v1302_v63 }
 0xadc   : > { %v2102_v3 = vpop.eup %2101  ;;  %v1290_v6 = vsel %vm671_vm6, %v2100_v1, 0.0  ;;  %v1268_v4 = vmul.f32 1.442695, %v1260_v47 }
 0xadd   : > { %2105 = vpow2.f32 %v1274_v2  ;;  %1291 = vadd.xlane.f32.xlu0 %v1290_v6  ;;  %v1287_v28 = vsel %vm671_vm6, %v2102_v3, 0.0 }
 0xade   : > { %1288 = vadd.xlane.f32.xlu2 %v1287_v28  ;;  %v1253_v7 = vpop.xlane.xlu2 %1252  ;;  %2107 = vpow2.f32 %v1268_v4 }
 0xadf   : > { %v1265_v5 = vsub.f32 %v1233_v44, %v1253_v7 }
 0xae0   : > { %v1250_v9 = vpop.xlane.xlu0 %1249 }
 0xae1   : > { %v2104_v10 = vpop.eup %2103  ;;  %v1278_v11 = vmul.f32 1.442695, %v1265_v5  ;;  %v1264_v13 = vsub.f32 %v1223_v36, %v1250_v9 }
 0xae2   : > { %v1305_v14 = vsel %vm671_vm6, %v2104_v10, 0.0 }
 0xae3   : > { %v2106_v16 = vpop.eup %2105  ;;  %2109 = vpow2.f32 %v1278_v11  ;;  %v1276_v12 = vmul.f32 1.442695, %v1264_v13  ;;  %1306 = vadd.xlane.f32.xlu1 %v1305_v14 }
 0xae4   : > { %v1293_v0 = vsel %vm671_vm6, %v2106_v16, 0.0  ;;  %v2108_v17 = vpop.eup %2107 }
 0xae5   : > { %2111 = vpow2.f32 %v1276_v12  ;;  %1294 = vadd.xlane.f32.xlu0 %v1293_v0  ;;  %v1284_v24 = vsel %vm671_vm6, %v2108_v17, 0.0 }
 0xae9   : > { %v2110_v18 = vpop.eup %2109 }
 0xaea   : > { %v1299_v20 = vsel %vm671_vm6, %v2110_v18, 0.0 }
 0xaeb   : > { %v2112_v23 = vpop.eup %2111  ;;  %1300 = vadd.xlane.f32.xlu1 %v1299_v20  ;;  %v1952_v20 = vld [vmem:[#allocation5 + $0x18] sm:$0xff] }
 0xaec   : > { %v1296_v25 = vsel %vm671_vm6, %v2112_v23, 0.0  ;;  %1439 = vmatpush.bf16.msrb.mxu1 %v1952_v20 }
 0xaed   : > { %1285 = vadd.xlane.f32.xlu0 %v1284_v24  ;;  %1297 = vadd.xlane.f32.xlu2 %v1296_v25 }
 0xb4e   : > { %v1304_v26 = vpop.xlane.xlu1 %1303 }
 0xb50   : > { %v1292_v29 = vpop.xlane.xlu0 %1291 }
 0xb51   : > { %v1289_v21 = vpop.xlane.xlu2 %1288 }
 0xb52   : > { %2113 = vrcp.f32 %v1289_v21 }
 0xb56   : > { %v1307_v30 = vpop.xlane.xlu1 %1306 }
 0xb57   : > { %2115 = vrcp.f32 %v1307_v30 }
 0xb58   : > { %v1295_v31 = vpop.xlane.xlu0 %1294  ;;  %v2114_v32 = vpop.eup %2113 }
 0xb59   : > { %2117 = vrcp.f32 %v1295_v31  ;;  %v1317_v42 = vmul.f32 %v2114_v32, %v2102_v3 }
 0xb5a   : > { %2119 = vrcp.f32 %v1292_v29 }
 0xb5b   : > { %2121 = vrcp.f32 %v1304_v26 }
 0xb5d   : > { %v2116_v22 = vpop.eup %2115 }
 0xb5e   : > { %v1301_v33 = vpop.xlane.xlu1 %1300  ;;  %v1323_v43 = vmul.f32 %v2116_v22, %v2104_v10 }
 0xb5f   : > { %v2118_v34 = vpop.eup %2117  ;;  %2123 = vrcp.f32 %v1301_v33  ;;  %v1447_v33 = vperm.slane %v2739_v19, 3 }
 0xb60   : > { %v1319_v35 = vmul.f32 %v2118_v34, %v2106_v16  ;;  %v1286_v36 = vpop.xlane.xlu0 %1285  ;;  %v1298_v37 = vpop.xlane.xlu2 %1297  ;;  %v1342_v52 = vrot.slane %v1323_v43, 4 }
 0xb61   : > { %v2120_v38 = vpop.eup %2119  ;;  %2125 = vrcp.f32 %v1286_v36 }
 0xb62   : > { %v2122_v39 = vpop.eup %2121  ;;  %v1330_v44 = vrot.slane %v1319_v35, 4  ;;  %2127 = vrcp.f32 %v1298_v37  ;;  %v1318_v45 = vmul.f32 %v2120_v38, %v2100_v1 }
 0xb63   : > { %v1322_v51 = vmul.f32 %v2122_v39, %v2792_v62 }
 0xb64   : > { %v1331_v49 = vsel %vm615_vm5, %v1330_v44, %v1317_v42  ;;  %v1324_v56 = vrot.slane %v1318_v45, 4 }
 0xb65   : > { %v2124_v50 = vpop.eup %2123  ;;  %v1335_v55 = vperm.slane %v1331_v49, %v2595_v15  ;;  %v1336_v59 = vrot.slane %v1322_v51, 4  ;;  %v1954_v49 = vld [vmem:[#allocation8 + $0x18] sm:$0xff] }
 0xb66   : > { %v1321_v53 = vmul.f32 %v2124_v50, %v2110_v18  ;;  %1503 = vmatpush.bf16.msrb.mxu2 %v1954_v49  ;;  %v1953_v50 = vld [vmem:[#allocation8 + $0x10] sm:$0xff] }
 0xb67   : > { %v2126_v54 = vpop.eup %2125  ;;  %v1348_v47 = vrot.slane %v1335_v55, 4 }
 0xb68   : > { %v2128_v48 = vpop.eup %2127  ;;  %v1343_v57 = vsel %vm615_vm5, %v1342_v52, %v1321_v53  ;;  %v1316_v58 = vmul.f32 %v2126_v54, %v2108_v17 }
 0xb69   : > { %v1347_v61 = vperm.slane %v1343_v57, %v2595_v15  ;;  %v1320_v40 = vmul.f32 %v2128_v48, %v2112_v23  ;;  %v1951_v23 = vld [vmem:[#allocation5 + $0x10] sm:$0xff] }
 0xb6a   : > { %v1325_v41 = vsel %vm615_vm5, %v1324_v56, %v1316_v58  ;;  %1440 = vmatpush.bf16.msrb.mxu1 %v1951_v23  ;;  %1504 = vmatpush.bf16.msrb.mxu2 %v1953_v50  ;;  %v1835_v56 = vld [vmem:[%s2902_s6 + $0x18] sm:$0x3] }
 0xb6b   : > { %v1329_v46 = vperm.slane %v1325_v41, %v2595_v15  ;;  %v1337_v62 = vsel %vm615_vm5, %v1336_v59, %v1320_v40  ;;  %v1360_v63 = vrot.slane %v1347_v61, 4  ;;  %v1471_v59 = vperm.slane %v1835_v56, 0 }
 0xb6c   : > { %v1341_v1 = vperm.slane %v1337_v62, %v2595_v15  ;;  %v1473_v41 = vperm.slane %v1835_v56, 1 }
 0xb6d   : > { %v1349_v2 = vsel %vm615_vm5, %v1348_v47, %v1329_v46  ;;  %v1350_v3 = vrot.slane %v1329_v46, 4 }
 0xb6e   : > { %v1355_v6 = vperm.slane %v1349_v2, %v2602_v27  ;;  %v1361_v28 = vsel %vm615_vm5, %v1360_v63, %v1341_v1  ;;  %v1362_v4 = vrot.slane %v1341_v1, 4  ;;  %v1958_v63 = vld [vmem:[%s2901_s5 + $0x38] sm:$0xff]  ;;  %v1957_v1 = vld [vmem:[%s2901_s5 + $0x30] sm:$0xff]  ;;  %v1956_v2 = vld [vmem:[%s2901_s5 + $0x28] sm:$0xff] }
 0xb6f   : > { %v1367_v7 = vperm.slane %v1361_v28, %v2602_v27  ;;  %v1351_v5 = vsel %vm615_vm5, %v1335_v55, %v1350_v3  ;;  %1560 = vmatpush.bf16.msrb.mxu3 %v1958_v63  ;;  %v1955_v3 = vld [vmem:[%s2901_s5 + $0x20] sm:$0xff] }
 0xb70   : > { %v1374_v9 = vrot.slane %v1355_v6, 4  ;;  %v1359_v10 = vperm.slane %v1351_v5, %v2602_v27  ;;  %v1363_v11 = vsel %vm615_vm5, %v1347_v61, %v1362_v4 }
 0xb71   : > { %v1372_v13 = vrot.slane %v1367_v7, 4  ;;  %v1371_v15 = vperm.slane %v1363_v11, %v2602_v27 }
 0xb72   : > { %v1375_v14 = vsel %vm615_vm5, %v1367_v7, %v1374_v9  ;;  %v1378_v16 = vrot.slane %v1359_v10, 4 }
 0xb73   : > { %1381 = vrot.lane.b32.xlu2 %v1375_v14, %s2361_s13  ;;  %v1376_v12 = vrot.slane %v1371_v15, 4  ;;  %v1373_v0 = vsel %vm615_vm5, %v1372_v13, %v1355_v6  ;;  %1561 = vmatpush.bf16.msrb.mxu3 %v1957_v1  ;;  %v1481_v6 = vperm.slane %v2739_v19, 4  ;;  %s2281_s13 = sshra.s32 %s1653_s29, 4  ;;  %s2282_s13 = int_to_ptr.hbm [resolvable:$true] %s2281_s13 }
 0xb74   : > { %v1379_v17 = vsel %vm615_vm5, %v1371_v15, %v1378_v16  ;;  %p2288_p3 = scmp.lt.s32.totalorder %s2282_s13, %s2907_s11 }
 0xb75   : > { %1389 = vrot.lane.b32.xlu1 %v1379_v17, %s2362_s19  ;;  %v1377_v18 = vsel %vm615_vm5, %v1376_v12, %v1359_v10  ;;  %v1570_v17 = vperm.slane %v2739_v19, 5  ;;  %vm1577_vm5 = vcmask 253952   ;;  %v1960_v19 = vld [vmem:[#allocation11 + $0x8] sm:$0xff]  ;;  %s2283_s19 = scalar_lea.hbm %s2282_s13, 1 }
 0xb76   : > { %1385 = vrot.lane.b32.xlu0 %v1377_v18, %s2360_s12  ;;  %1631 = vmatpush.bf16.msra.mxu0 %v1960_v19  ;;  %s1640_s12 = scalar_lea.sflag [#allocation7], %s424_s15  ;;  %p2284_p0 = scmp.ne.s32.totalorder %s2282_s13, %s2283_s19 }
 0xb77   : > { %1562 = vmatpush.bf16.msrb.mxu3 %v1956_v2  ;;  %p2289_p4 = scmp.lt.s32.totalorder %s2287_s14, %s2283_s19 }
 0xb78   : > { %p2285_p1 = pnand %p2284_p0, %p2464_p5 }
 0xb79   : > { %p2290_p7 = por %p2289_p4, %p2288_p3 }
 0xb7a   : > { %p2286_p2 = pneg %p2285_p1 }
 0xb7b   : > { %1563 = vmatpush.bf16.msrb.mxu3 %v1955_v3 }
 0xb7c   : > { %p2291_p8 = pnand %p2290_p7, %p2286_p2 }
 0xbcd   : > { %v1382_v27 = vpop.permute.xlu2 %1381 }
 0xbce   : > { %v1392_v25 = vsel %vm828_vm7, %v1373_v0, %v1382_v27 }
 0xbe7   : > { %v1390_v24 = vpop.permute.xlu1 %1389 }
 0xbe8   : > { %v1386_v26 = vpop.permute.xlu0 %1385 }
 0xbe9   : > { %v1393_v29 = vsel %vm830_vm8, %v1392_v25, %v1386_v26 }
 0xbea   : > { %v1394_v21 = vsel %vm832_vm9, %v1393_v29, %v1390_v24 }
 0xbeb   : > { %v1395_v30 = vpack.c.bf16 %v1394_v21, %v1394_v21 }
 0xbed   : > { %1876 = vmatmul.msk.bf16.vlgmr.msrb.gmra.mxu0 %vm439_vm0, %v1395_v30 }
 0xc6a   : > { %v1408_v31 = vpop.f32.mrf.mxu0 }
 0xc6b   : > { %v1417_v32 = vpack.c.bf16 %v1408_v31, %v1408_v31 }
 0xc6d   : > { %1885 = vmatmul.msk.bf16.vlgmr.msrb.gmra.mxu1 %vm439_vm0, %v1417_v32  ;;  %v1959_v32 = vld [vmem:[#allocation11] sm:$0xff] }
 0xc6e   : > { %1632 = vmatpush.bf16.msra.mxu0 %v1959_v32 }
 0xc72   : > { %v1410_v22 = vpop.f32.mrf.mxu0 }
 0xcea   : > { %v1442_v34 = vpop.f32.mrf.mxu1 }
 0xceb   : > { %v1446_v35 = vadd.f32 %v1442_v34, %v2710_v60 }
 0xced   : > { %v1448_v36 = vadd.f32 %v1447_v33, %v1446_v35 }
 0xcef   : > { %v1449_v37 = vsel %vm439_vm0, %v1448_v36, 0.0 }
 0xcf0   : > { %1450 = vadd.xlane.f32.xlu0 %v1449_v37 }
 0xcf2   : > { %v1444_v38 = vpop.f32.mrf.mxu1 }
 0xd63   : > { %v1451_v39 = vpop.xlane.xlu0 %1450 }
 0xd64   : > { %v1452_v42 = vmul.f32 %v1451_v39, %v2530_v8 }
 0xd66   : > { %v1453_v43 = vsub.f32 %v1448_v36, %v1452_v42  ;;  %v1576_v42 = vld [vmem:[%s2905_s9] sm:$0x3] }
 0xd68   : > { %v1454_v44 = vmul.f32 %v1453_v43, %v1453_v43 }
 0xd6a   : > { %v1455_v45 = vsel %vm439_vm0, %v1454_v44, 0.0 }
 0xd6b   : > { %1456 = vadd.xlane.f32.xlu2 %v1455_v45  ;;  %v1602_v45 = vrot.slane %v1576_v42, 1 }
 0xdde   : > { %v1457_v51 = vpop.xlane.xlu2 %1456 }
 0xddf   : > { %v1458_v60 = vmul.f32 %v1457_v51, %v2530_v8 }
 0xde1   : > { %v1459_v52 = vadd.f32 1e-05, %v1458_v60 }
 0xde3   : > { %2129 = vrsqrt.f32 %v1459_v52  ;;  %vm1466_vm3 = vweird.f32 %v1459_v52 }
 0xde9   : > { %v2130_v53 = vpop.eup %2129 }
 0xdea   : > { %v1461_v54 = vmul.f32 %v2130_v53, %v1459_v52  ;;  %vm1467_vm2 = vweird.f32 %v2130_v53 }
 0xdeb   : > { %vm1468_vm4 = vmor %vm1466_vm3, %vm1467_vm2 }
 0xdec   : > { %v1462_v55 = vmul.f32 %v2130_v53, %v1461_v54 }
 0xdee   : > { %v1463_v48 = vmul.f32 0.5, %v1462_v55 }
 0xdf0   : > { %v1464_v57 = vsub.f32 1.5, %v1463_v48 }
 0xdf2   : > { %v1465_v58 = vmul.f32 %v2130_v53, %v1464_v57 }
 0xdf4   : > { %v1469_v61 = vsel %vm1468_vm4, %v2130_v53, %v1465_v58 }
 0xdf5   : > { %v1470_v40 = vmul.f32 %v1469_v61, %v1453_v43 }
 0xdf7   : > { %v1472_v46 = vmul.f32 %v1471_v59, %v1470_v40 }
 0xdf9   : > { %v1474_v62 = vadd.f32 %v1473_v41, %v1472_v46 }
 0xdfb   : > { %v1480_v47 = vpack.c.bf16 %v1474_v62, %v1474_v62 }
 0xdfd   : > { %1894 = vmatmul.msk.bf16.vlgmr.msrb.gmra.mxu2 %vm439_vm0, %v1480_v47 }
 0xe80   : > { %v1506_v28 = vpop.f32.mrf.mxu2 }
 0xe81   : > { %v1507_v4 = vadd.f32 %v1506_v28, %v1481_v6 }
 0xe83   : > { %v1510_v7 = vmul.f32 %v1507_v4, %v1507_v4 }
 0xe85   : > { %v1511_v5 = vmul.f32 %v1510_v7, %v1507_v4 }
 0xe87   : > { %v1512_v9 = vmul.f32 0.044715, %v1511_v5 }
 0xe88   : > { %v1508_v10 = vpop.f32.mrf.mxu2 }
 0xe89   : > { %v1513_v11 = vadd.f32 %v1512_v9, %v1507_v4 }
 0xe8b   : > { %v1514_v13 = vmul.f32 0.7978846, %v1513_v11 }
 0xe8d   : > { %2131 = vtanh.f32 %v1514_v13 }
 0xe93   : > { %v2132_v15 = vpop.eup %2131 }
 0xe94   : > { %v1516_v14 = vadd.f32 1.0, %v2132_v15 }
 0xe96   : > { %v1517_v16 = vmul.f32 0.5, %v1516_v14 }
 0xe98   : > { %v1518_v12 = vmul.f32 %v1517_v16, %v1507_v4 }
 0xe9a   : > { %v1528_v0 = vpack.c.bf16 %v1518_v12, %v1518_v12 }
 0xe9c   : > { %1919 = vmatmul.msk.bf16.vlgmr.msrb.gmra.mxu3 %vm989_vm13, %v1528_v0 }
 0xf1f   : > { %v1565_v18 = vpop.f32.mrf.mxu3 }
 0xf20   : > { %v1569_v20 = vadd.f32 %v1565_v18, %v1448_v36 }
 0xf22   : > { %v1571_v23 = vadd.f32 %v1570_v17, %v1569_v20 }
 0xf24   : > { %1572 = vst.msk [vmem:[#allocation2] sm:$0xff] %vm439_vm0, %v1571_v23 }
 0xf27   : > { %v1567_v27 = vpop.f32.mrf.mxu3 }
 0xf2b   : > { %v1575_v24 = vld [vmem:[%s1574_s25] sm:$0x1] }
 0xf2c   : > { %v1578_v25 = vsel %vm1577_vm5, %v1575_v24, 0.0 }
 0xf2d   : > { %1579 = vadd.xlane.f32.xlu1 %v1578_v25 }
 0xfa0   : > { %v1580_v26 = vpop.xlane.xlu1 %1579 }
 0xfa1   : > { %v1581_v29 = vmul.f32 %v1580_v26, %v2530_v8 }
 0xfa3   : > { %v1582_v21 = vsub.f32 %v1575_v24, %v1581_v29 }
 0xfa5   : > { %v1583_v30 = vmul.f32 %v1582_v21, %v1582_v21 }
 0xfa7   : > { %v1584_v31 = vsel %vm1577_vm5, %v1583_v30, 0.0 }
 0xfa8   : > { %1585 = vadd.xlane.f32.xlu0 %v1584_v31 }
0x101b   : > { %v1586_v22 = vpop.xlane.xlu0 %1585 }
0x101c   : > { %v1587_v33 = vmul.f32 %v1586_v22, %v2530_v8 }
0x101e   : > { %v1588_v34 = vadd.f32 1e-05, %v1587_v33 }
0x1020   : > { %2133 = vrsqrt.f32 %v1588_v34  ;;  %vm1595_vm7 = vweird.f32 %v1588_v34 }
0x1026   : > { %v2134_v35 = vpop.eup %2133 }
0x1027   : > { %v1590_v36 = vmul.f32 %v2134_v35, %v1588_v34  ;;  %vm1596_vm6 = vweird.f32 %v2134_v35 }
0x1028   : > { %vm1597_vm8 = vmor %vm1595_vm7, %vm1596_vm6 }
0x1029   : > { %v1591_v37 = vmul.f32 %v2134_v35, %v1590_v36 }
0x102b   : > { %v1592_v38 = vmul.f32 0.5, %v1591_v37 }
0x102d   : > { %v1593_v39 = vsub.f32 1.5, %v1592_v38 }
0x102f   : > { %v1594_v43 = vmul.f32 %v2134_v35, %v1593_v39 }
0x1031   : > { %v1598_v44 = vsel %vm1597_vm8, %v2134_v35, %v1594_v43 }
0x1032   : > { %v1599_v8 = vmul.f32 %v1598_v44, %v1582_v21 }
0x1034   : > { %v1600_v49 = vmul.f32 %v1599_v8, %v1576_v42 }
0x1036   : > { %v1604_v50 = vadd.f32 %v1602_v45, %v1600_v49 }
0x1038   : > { %v1609_v51 = vpack.c.bf16 %v1604_v50, %v1604_v50 }
0x103a   : > { %1928 = vmatmul.msk.bf16.vlgmr.msra.gmra.mxu0 %vm439_vm0, %v1609_v51 }
0x10b7   : > { %v1634_v60 = vpop.f32.mrf.mxu0 }
0x10b8   : > { %1638 = vst [vmem:[%s425_s23] sm:$0x1] %v1634_v60 }
0x10b9   : > { %2294 = shalt.err (!%p2291_p8)
}
0x10ba   : > { %1977 = dma.vmem_to_hbm [thread:$0]  (%p2464_p5), %s1651_s26, 16, %s1653_s29, %s1640_s12  }
0x10bf   : > { %v1636_v52 = vpop.f32.mrf.mxu0 }
0x10c0 PF: > { %s2926_s18 = sld [smem:[#allocation19_spill]]  ;;  %p2004_p9 = scmp.ge.s32.totalorder %s2343_s24, 2 }
0x10c2   : > { %p1993_p10 = pnand %p2004_p9, %p2468_p6 }
0x10c4   : > { %p1994_p11 = pneg %p1993_p10 }
0x10c6   : > { %s1664_s16 = sand.u32 1, %s2926_s18  }
0x10c7   : > { %s1665_s27 = scalar_lea.sflag [#allocation7], %s1664_s16 }
0x10c8   : > { %2326 = dma.done.wait (%p1994_p11), %s1665_s27, 16  }
0x10c9   : > { %2328 = vsyncadd (%p1994_p11), %s1665_s27, 4294967280  ;;  %s2928_s24 = sld [smem:[#allocation21_spill]]  ;;  %s2931_s21 = smov %s2335_s22 }
0x10ca   : > { %s2929_s15 = sld [smem:[#allocation20_spill]] }
0x10cb   : > { %s2930_s23 = sld [smem:[#allocation22_spill]] }
0x10cf   : > { %p32_p12 = scmp.ge.s32.totalorder %s2928_s24, 4  }
0x10d0   : > { %s2932_s22 = smov %s2929_s15 }
0x10d1   :  { %34 = sbr.rel (!%p32_p12) target bundleno = 13 (0xd), region = 122 }
0x10d6   :  { %1670 = vsyncpa [#allocation6], 1 }
0x10d7   :  { %1672 = vsyncpa [#allocation6 + $0x1], 1 }
0x10d8   :  { %1673 = vsyncpa [#allocation9], 1 }
0x10d9   :  { %1674 = vsyncpa [#allocation12], 1 }
0x10da   :  { %1675 = vsyncpa [#allocation7], 1 }
0x10db   :  { %1677 = vsyncpa [#allocation7 + $0x1], 1 }

</bundles_post_ra>
